<compile_context>
chip_gen: v7x
topology: tpu7x:2x2x1
jax: 0.10.0
libtpu: 0.0.40
codegen_flags: <defaults>
</compile_context>

<pallas_src>
import functools

import jax
import jax.numpy as jnp
from jax.experimental import pallas as pl
from jax.experimental.pallas import tpu as pltpu

# ---------------- small synthetic CLIP-ViT config ----------------
PATCH = 8          # conv1 kernel == stride (patchify)
WIDTH = 32         # transformer width
HEADS = 4
HEAD_DIM = WIDTH // HEADS
LAYERS = 2
MLP_DIM = 4 * WIDTH
OUT_DIM = 16       # CLIP visual projection output dim
LN_EPS = 1e-5

# ---------------- padded (lane/sublane dense) layout constants ----------------
LANE = 128
SUB = 8


def _round_up(x, m):
    return ((x + m - 1) // m) * m


D_PAD = _round_up(WIDTH, LANE)      # 128 lanes for the feature axis
MLP_PAD = _round_up(MLP_DIM, LANE)  # 128
OUT_PAD = _round_up(OUT_DIM, LANE)  # 128

assert MLP_PAD % D_PAD == 0, "mlp_fc bias packing assumes MLP_PAD is a multiple of D_PAD"
SMALL_ROWS = 9 + MLP_PAD // D_PAD   # per-layer small-param rows (see packing below)


# ---------------- fused ViT kernel (whole network, layers resident in VMEM) ----------------
def _fused_vit_kernel(patches_ref, w_patch_ref, tokpos_ref, ln_io_ref,
                      w_qkv_ref, w_ao_ref, w_fc_ref, w_pj_ref, small_ref,
                      w_vp_ref, out_ref, *, bt, s_real):
    sp = tokpos_ref.shape[0]
    rows = bt * sp
    inv_d = 1.0 / WIDTH
    bf16 = jnp.bfloat16

    def layer_norm(x, g, b):
        # Invariant: padded feature lanes of x are exactly zero, so plain lane sums give the
        # real-lane statistics; g/b are zero-padded so the output keeps padded lanes zero.
        mu = jnp.sum(x, axis=-1, keepdims=True) * inv_d
        var = jnp.sum(x * x, axis=-1, keepdims=True) * inv_d - mu * mu
        return (x - mu) * jax.lax.rsqrt(var + LN_EPS) * g + b

    # ---- hoisted masks (built once per grid step) ----
    lane3 = jax.lax.broadcasted_iota(jnp.int32, (HEADS, 1, D_PAD), 2)
    head3 = jax.lax.broadcasted_iota(jnp.int32, (HEADS, 1, D_PAD), 0)
    head_mask = jnp.logical_and(lane3 >= head3 * HEAD_DIM,
                                lane3 < (head3 + 1) * HEAD_DIM).astype(jnp.float32)
    key_mask = jax.lax.broadcasted_iota(jnp.int32, (1, sp), 1) < s_real

    ln_io = ln_io_ref[...]                       # rows: ln_pre_g, ln_pre_b, ln_post_g, ln_post_b

    # ---- patch-embed matmul (all batch rows at once) + [CLS]/pos + ln_pre ----
    patches = patches_ref[...].reshape(rows, patches_ref.shape[-1])         # bf16 (rows, cpp_pad)
    emb = jnp.dot(patches, w_patch_ref[...], preferred_element_type=jnp.float32)
    tok = jnp.broadcast_to(tokpos_ref[...][None], (bt, sp, D_PAD)).reshape(rows, D_PAD)
    x = layer_norm(emb + tok, ln_io[0:1, :], ln_io[1:2, :])                 # (rows, D_PAD) f32

    scale = 1.0 / (HEAD_DIM ** 0.5)
    for l in range(LAYERS):                       # static unroll: weights resident, no per-layer DMA
        sm = small_ref[l]                         # (SMALL_ROWS, D_PAD) f32

        # -------- multi-head self-attention block --------
        y = layer_norm(x, sm[0:1, :], sm[1:2, :])
        qkv = jnp.dot(y.astype(bf16), w_qkv_ref[l], preferred_element_type=jnp.float32)
        q = (qkv[:, 0:D_PAD] + sm[6:7, :]) * scale                          # scale folded into q
        k = (qkv[:, D_PAD:2 * D_PAD] + sm[7:8, :]).astype(bf16)
        v = (qkv[:, 2 * D_PAD:3 * D_PAD] + sm[8:9, :]).astype(bf16)

        attn_parts = []
        for b in range(bt):                       # per-image scores (block-diagonal attention)
            qb = q[b * sp:(b + 1) * sp, :]                                   # (sp, D_PAD) f32
            q_stk = (qb[None] * head_mask).astype(bf16).reshape(HEADS * sp, D_PAD)
            kb = k[b * sp:(b + 1) * sp, :]
            vb = v[b * sp:(b + 1) * sp, :]
            # trans_b on the MXU: contract lane dims of both operands (no materialized k^T).
            s = jax.lax.dot_general(q_stk, kb, (((1,), (1,)), ((), ())),
                                    preferred_element_type=jnp.float32)     # (HEADS*sp, sp)
            s = jnp.where(key_mask, s, -1e30)                                # mask padded keys
            s = s - jnp.max(s, axis=-1, keepdims=True)
            p = jnp.exp(s)
            p = p * pl.reciprocal(jnp.sum(p, axis=-1, keepdims=True), approx=True)
            o_stk = jnp.dot(p.astype(bf16), vb, preferred_element_type=jnp.float32)
            # keep only head-h lanes of head-h's row block, then sum the head blocks
            attn_parts.append(jnp.sum(o_stk.reshape(HEADS, sp, D_PAD) * head_mask, axis=0))
        attn_o = jnp.concatenate(attn_parts, axis=0)                         # (rows, D_PAD)

        x = x + jnp.dot(attn_o.astype(bf16), w_ao_ref[l],
                        preferred_element_type=jnp.float32) + sm[4:5, :]

        # -------- MLP block (QuickGELU) --------
        y = layer_norm(x, sm[2:3, :], sm[3:4, :])
        hid = jnp.dot(y.astype(bf16), w_fc_ref[l], preferred_element_type=jnp.float32)
        hid = hid + sm[9:9 + MLP_PAD // D_PAD, :].reshape(1, MLP_PAD)
        hid = hid * jax.nn.sigmoid(1.702 * hid)                              # QuickGELU, f32
        x = x + jnp.dot(hid.astype(bf16), w_pj_ref[l],
                        preferred_element_type=jnp.float32) + sm[5:6, :]

    # ---- ln_post on CLS tokens + visual projection ----
    cls = x.reshape(bt, sp, D_PAD)[:, 0, :]                                  # (bt, D_PAD)
    cls = layer_norm(cls, ln_io[2:3, :], ln_io[3:4, :])
    out = jnp.dot(cls.astype(bf16), w_vp_ref[...], preferred_element_type=jnp.float32)
    out_ref[...] = out[:, None, :]                                           # (bt, 1, OUT_PAD)


# ---------------- parameters (deterministic, synthetic, PyTorch-like shapes) ----------------
def init_params(key, img_size=16, in_ch=3):
    grid = img_size // PATCH
    seq = grid * grid + 1
    keys = iter(jax.random.split(key, 64))

    def rnd(shape, std=0.02):
        return std * jax.random.normal(next(keys), shape, jnp.float32)

    params = {
        "conv1_w": rnd((WIDTH, in_ch, PATCH, PATCH)),
        "class_embedding": rnd((WIDTH,)),
        "pos_embedding": rnd((seq, WIDTH)),
        "ln_pre_g": jnp.ones((WIDTH,), jnp.float32),
        "ln_pre_b": jnp.zeros((WIDTH,), jnp.float32),
        "ln_post_g": jnp.ones((WIDTH,), jnp.float32),
        "ln_post_b": jnp.zeros((WIDTH,), jnp.float32),
        "proj": rnd((WIDTH, OUT_DIM)),
        "layers": [],
    }
    for _ in range(LAYERS):
        params["layers"].append({
            "ln1_g": jnp.ones((WIDTH,), jnp.float32),
            "ln1_b": jnp.zeros((WIDTH,), jnp.float32),
            "qkv_w": rnd((WIDTH, 3 * WIDTH)),
            "qkv_b": jnp.zeros((3 * WIDTH,), jnp.float32),
            "attn_out_w": rnd((WIDTH, WIDTH)),
            "attn_out_b": jnp.zeros((WIDTH,), jnp.float32),
            "ln2_g": jnp.ones((WIDTH,), jnp.float32),
            "ln2_b": jnp.zeros((WIDTH,), jnp.float32),
            "mlp_fc_w": rnd((WIDTH, MLP_DIM)),
            "mlp_fc_b": jnp.zeros((MLP_DIM,), jnp.float32),
            "mlp_proj_w": rnd((MLP_DIM, WIDTH)),
            "mlp_proj_b": jnp.zeros((WIDTH,), jnp.float32),
        })
    return params


# ---------------- padding / stacking glue (layout plumbing only) ----------------
def _pad2(w, rows, cols):
    return jnp.zeros((rows, cols), jnp.float32).at[:w.shape[0], :w.shape[1]].set(w)


def _pad_vec(v, cols):
    return jnp.zeros((cols,), jnp.float32).at[:v.shape[0]].set(v)


# ---------------- forward (CLIP encode_image) ----------------
def clip_encode_image(img, params):
    # img: NCHW float32, exactly like the PyTorch module's input.
    B, C, H, W = img.shape
    G = H // PATCH
    s_real = G * G + 1
    sp = _round_up(s_real, SUB)
    cpp = C * PATCH * PATCH
    cpp_pad = _round_up(cpp, LANE)
    BT = B                     # whole (small) batch per grid step; tile for large B

    # --- patch extraction (pure reshape/transpose glue), padded to (B, sp, cpp_pad), bf16 ---
    patches = img.reshape(B, C, G, PATCH, G, PATCH).transpose(0, 2, 4, 1, 3, 5)
    patches = patches.reshape(B, G * G, cpp)
    patches_pad = jnp.zeros((B, sp, cpp_pad), jnp.float32)
    patches_pad = patches_pad.at[:, 1:1 + G * G, :cpp].set(patches)     # row 0 = CLS slot
    patches_pad = patches_pad.astype(jnp.bfloat16)

    # --- token template: class embedding + positional embedding (padded, f32) ---
    tokpos = jnp.zeros((sp, D_PAD), jnp.float32)
    tokpos = tokpos.at[0, :WIDTH].set(params["class_embedding"])
    tokpos = tokpos.at[:s_real, :WIDTH].add(params["pos_embedding"])

    # --- non-layer params ---
    w_p = params["conv1_w"].reshape(WIDTH, cpp).T                        # (cpp, WIDTH), no conv bias
    w_patch = _pad2(w_p, cpp_pad, D_PAD).astype(jnp.bfloat16)
    ln_io = jnp.stack([_pad_vec(params["ln_pre_g"], D_PAD),
                       _pad_vec(params["ln_pre_b"], D_PAD),
                       _pad_vec(params["ln_post_g"], D_PAD),
                       _pad_vec(params["ln_post_b"], D_PAD)], axis=0)    # (4, D_PAD)
    w_vp = _pad2(params["proj"], D_PAD, OUT_PAD).astype(jnp.bfloat16)    # no bias in CLIP proj

    # --- per-layer weights: zero-padded, layer-stacked, bf16 for matmul operands ---
    w_qkv, w_ao, w_fc, w_pj, small = [], [], [], [], []
    for lp in params["layers"]:
        wq, wk, wv = jnp.split(lp["qkv_w"], 3, axis=1)
        wqkv = jnp.zeros((D_PAD, 3 * D_PAD), jnp.float32)
        wqkv = wqkv.at[:WIDTH, 0:WIDTH].set(wq)
        wqkv = wqkv.at[:WIDTH, D_PAD:D_PAD + WIDTH].set(wk)
        wqkv = wqkv.at[:WIDTH, 2 * D_PAD:2 * D_PAD + WIDTH].set(wv)
        w_qkv.append(wqkv.astype(jnp.bfloat16))
        w_ao.append(_pad2(lp["attn_out_w"], D_PAD, D_PAD).astype(jnp.bfloat16))
        w_fc.append(_pad2(lp["mlp_fc_w"], D_PAD, MLP_PAD).astype(jnp.bfloat16))
        w_pj.append(_pad2(lp["mlp_proj_w"], MLP_PAD, D_PAD).astype(jnp.bfloat16))

        # all tiny per-layer vectors packed into one tensor (rows of width D_PAD):
        #   0 ln1_g, 1 ln1_b, 2 ln2_g, 3 ln2_b, 4 attn_out_b, 5 mlp_proj_b,
        #   6 q_b, 7 k_b, 8 v_b, 9.. mlp_fc_b (MLP_PAD // D_PAD rows)
        bq, bk, bv = jnp.split(lp["qkv_b"], 3)
        sm = jnp.zeros((SMALL_ROWS, D_PAD), jnp.float32)
        sm = sm.at[0, :WIDTH].set(lp["ln1_g"])
        sm = sm.at[1, :WIDTH].set(lp["ln1_b"])
        sm = sm.at[2, :WIDTH].set(lp["ln2_g"])
        sm = sm.at[3, :WIDTH].set(lp["ln2_b"])
        sm = sm.at[4, :WIDTH].set(lp["attn_out_b"])
        sm = sm.at[5, :WIDTH].set(lp["mlp_proj_b"])
        sm = sm.at[6, :WIDTH].set(bq)
        sm = sm.at[7, :WIDTH].set(bk)
        sm = sm.at[8, :WIDTH].set(bv)
        fc_b = _pad_vec(lp["mlp_fc_b"], MLP_PAD).reshape(MLP_PAD // D_PAD, D_PAD)
        sm = sm.at[9:9 + MLP_PAD // D_PAD, :].set(fc_b)
        small.append(sm)

    stack = lambda xs: jnp.stack(xs, axis=0)

    # --- single fused pallas_call: grid over batch blocks only; all layer weights resident ---
    batch3 = lambda i: (i, 0, 0)
    const2 = lambda i: (0, 0)
    const3 = lambda i: (0, 0, 0)

    in_specs = [
        pl.BlockSpec((BT, sp, cpp_pad), batch3),            # patches (per batch block, bf16)
        pl.BlockSpec((cpp_pad, D_PAD), const2),             # patch-embed weight
        pl.BlockSpec((sp, D_PAD), const2),                  # cls + pos template
        pl.BlockSpec((4, D_PAD), const2),                   # ln_pre / ln_post gamma+beta
        pl.BlockSpec((LAYERS, D_PAD, 3 * D_PAD), const3),   # qkv weights (all layers)
        pl.BlockSpec((LAYERS, D_PAD, D_PAD), const3),       # attn out-proj weights
        pl.BlockSpec((LAYERS, D_PAD, MLP_PAD), const3),     # mlp fc weights
        pl.BlockSpec((LAYERS, MLP_PAD, D_PAD), const3),     # mlp proj weights
        pl.BlockSpec((LAYERS, SMALL_ROWS, D_PAD), const3),  # packed small per-layer params
        pl.BlockSpec((D_PAD, OUT_PAD), const2),             # visual projection
    ]
    out_spec = pl.BlockSpec((BT, 1, OUT_PAD), batch3)

    kernel = functools.partial(_fused_vit_kernel, bt=BT, s_real=s_real)
    fea_pad = pl.pallas_call(
        kernel,
        out_shape=jax.ShapeDtypeStruct((B, 1, OUT_PAD), jnp.float32),
        grid_spec=pltpu.PrefetchScalarGridSpec(
            num_scalar_prefetch=0,
            grid=(pl.cdiv(B, BT),),
            in_specs=in_specs,
            out_specs=out_spec,
        ),
        compiler_params=pltpu.CompilerParams(
            dimension_semantics=("parallel",),
            vmem_limit_bytes=32 * 1024 * 1024),   # explicit headroom (v7x: 64 MiB physical)
    )(patches_pad, w_patch, tokpos, ln_io,
      stack(w_qkv), stack(w_ao), stack(w_fc), stack(w_pj), stack(small), w_vp)

    return fea_pad[:, 0, :OUT_DIM]   # (B, OUT_DIM) float32 (inference only)


# TODO(synk): clip.load() pretrained checkpoint + self.preprocess have no Pallas equivalent;
#             weights here are synthetic deterministic inits with the same structural shapes.

if __name__ == "__main__":
    key = jax.random.PRNGKey(0)
    pkey, xkey = jax.random.split(key)

    params = init_params(pkey, img_size=16, in_ch=3)
    img = jax.random.normal(xkey, (2, 3, 16, 16), jnp.float32)   # NCHW like PyTorch

    fea = jax.jit(clip_encode_image)(img, params)
    fea = jax.block_until_ready(fea)

    assert fea.shape == (2, OUT_DIM)
    assert fea.dtype == jnp.float32
    assert bool(jnp.all(jnp.isfinite(fea)))
    print("KERNEL_OK")
</pallas_src>

<mosaic_0001>
module attributes {stable_mosaic.version = 11 : i64} {
  func.func @_fused_vit_kernel(%arg0: i32, %arg1: memref<2x8x256xbf16, #tpu.memory_space<vmem>>, %arg2: memref<256x128xbf16, #tpu.memory_space<vmem>>, %arg3: memref<8x128xf32, #tpu.memory_space<vmem>>, %arg4: memref<4x128xf32, #tpu.memory_space<vmem>>, %arg5: memref<2x128x384xbf16, #tpu.memory_space<vmem>>, %arg6: memref<2x128x128xbf16, #tpu.memory_space<vmem>>, %arg7: memref<2x128x128xbf16, #tpu.memory_space<vmem>>, %arg8: memref<2x128x128xbf16, #tpu.memory_space<vmem>>, %arg9: memref<2x10x128xf32, #tpu.memory_space<vmem>>, %arg10: memref<128x128xbf16, #tpu.memory_space<vmem>>, %arg11: memref<2x1x128xf32, #tpu.memory_space<vmem>>) attributes {dimension_semantics = [#tpu.dimension_semantics<parallel>], iteration_bounds = array<i64: 1>, scalar_prefetch = 0 : i64, scratch_operands = 0 : i64, tpu.core_type = #tpu.core_type<tc>, window_params = [{transform_indices = @transform_0, window_bounds = array<i64: 2, 8, 256>}, {pipeline_mode = #tpu.pipeline_mode<synchronous>, transform_indices = @transform_1, window_bounds = array<i64: 256, 128>}, {pipeline_mode = #tpu.pipeline_mode<synchronous>, transform_indices = @transform_2, window_bounds = array<i64: 8, 128>}, {pipeline_mode = #tpu.pipeline_mode<synchronous>, transform_indices = @transform_3, window_bounds = array<i64: 4, 128>}, {pipeline_mode = #tpu.pipeline_mode<synchronous>, transform_indices = @transform_4, window_bounds = array<i64: 2, 128, 384>}, {pipeline_mode = #tpu.pipeline_mode<synchronous>, transform_indices = @transform_5, window_bounds = array<i64: 2, 128, 128>}, {pipeline_mode = #tpu.pipeline_mode<synchronous>, transform_indices = @transform_6, window_bounds = array<i64: 2, 128, 128>}, {pipeline_mode = #tpu.pipeline_mode<synchronous>, transform_indices = @transform_7, window_bounds = array<i64: 2, 128, 128>}, {pipeline_mode = #tpu.pipeline_mode<synchronous>, transform_indices = @transform_8, window_bounds = array<i64: 2, 10, 128>}, {pipeline_mode = #tpu.pipeline_mode<synchronous>, transform_indices = @transform_9, window_bounds = array<i64: 128, 128>}, {transform_indices = @transform_10, window_bounds = array<i64: 2, 1, 128>}]} {
    %0 = tpu.iota {dimensions = array<i32: 2>} : vector<4x1x128xi32>
    %1 = tpu.iota {dimensions = array<i32: 0>} : vector<4x1x128xi32>
    %c8_i32 = arith.constant 8 : i32
    %2 = vector.broadcast %c8_i32 : i32 to vector<4x1x128xi32>
    %3 = arith.muli %1, %2 : vector<4x1x128xi32>
    %4 = arith.cmpi sge, %0, %3 : vector<4x1x128xi32>
    %c1_i32 = arith.constant 1 : i32
    %5 = vector.broadcast %c1_i32 : i32 to vector<4x1x128xi32>
    %6 = arith.addi %1, %5 : vector<4x1x128xi32>
    %c8_i32_0 = arith.constant 8 : i32
    %7 = vector.broadcast %c8_i32_0 : i32 to vector<4x1x128xi32>
    %8 = arith.muli %6, %7 : vector<4x1x128xi32>
    %9 = arith.cmpi slt, %0, %8 : vector<4x1x128xi32>
    %10 = arith.andi %4, %9 : vector<4x1x128xi1>
    %11 = arith.extui %10 : vector<4x1x128xi1> to vector<4x1x128xi32>
    %12 = arith.sitofp %11 : vector<4x1x128xi32> to vector<4x1x128xf32>
    %13 = tpu.iota {dimensions = array<i32: 1>} : vector<1x8xi32>
    %c5_i32 = arith.constant 5 : i32
    %14 = vector.broadcast %c5_i32 : i32 to vector<1x8xi32>
    %15 = arith.cmpi slt, %13, %14 : vector<1x8xi32>
    %c0 = arith.constant 0 : index
    %c0_1 = arith.constant 0 : index
    %16 = vector.load %arg4[%c0, %c0_1] : memref<4x128xf32, #tpu.memory_space<vmem>>, vector<4x128xf32>
    %c0_2 = arith.constant 0 : index
    %c0_3 = arith.constant 0 : index
    %c0_4 = arith.constant 0 : index
    %17 = vector.load %arg1[%c0_2, %c0_3, %c0_4] : memref<2x8x256xbf16, #tpu.memory_space<vmem>>, vector<2x8x256xbf16>
    %18 = vector.shape_cast %17 : vector<2x8x256xbf16> to vector<16x256xbf16>
    %c0_5 = arith.constant 0 : index
    %c0_6 = arith.constant 0 : index
    %19 = vector.load %arg2[%c0_5, %c0_6] : memref<256x128xbf16, #tpu.memory_space<vmem>>, vector<256x128xbf16>
    %cst = arith.constant dense<0.000000e+00> : vector<16x128xf32>
    %20 = tpu.matmul %18, %19, %cst {dimension_numbers = #tpu.dot_dimension_numbers<[1], [0], [0], [1], [0, 0, 1, 1], [], []>} : vector<16x256xbf16>, vector<256x128xbf16>, vector<16x128xf32> -> vector<16x128xf32>
    %c0_7 = arith.constant 0 : index
    %c0_8 = arith.constant 0 : index
    %21 = vector.load %arg3[%c0_7, %c0_8] : memref<8x128xf32, #tpu.memory_space<vmem>>, vector<8x128xf32>
    %22 = vector.shape_cast %21 : vector<8x128xf32> to vector<1x8x128xf32>
    %23 = vector.shape_cast %22 : vector<1x8x128xf32> to vector<1x8x128xf32>
    %24 = vector.broadcast %23 : vector<1x8x128xf32> to vector<2x8x128xf32>
    %25 = vector.shape_cast %24 : vector<2x8x128xf32> to vector<16x128xf32>
    %26 = arith.addf %20, %25 : vector<16x128xf32>
    %27 = vector.extract_strided_slice %16 {offsets = [0, 0], sizes = [1, 128], strides = [1, 1]} : vector<4x128xf32> to vector<1x128xf32>
    %28 = vector.extract_strided_slice %16 {offsets = [1, 0], sizes = [1, 128], strides = [1, 1]} : vector<4x128xf32> to vector<1x128xf32>
    %cst_9 = arith.constant dense<0.000000e+00> : vector<16xf32>
    %29 = vector.multi_reduction <add>, %26, %cst_9 [1] : vector<16x128xf32> to vector<16xf32>
    %30 = vector.shape_cast %29 : vector<16xf32> to vector<16x1xf32>
    %cst_10 = arith.constant 3.125000e-02 : f32
    %31 = vector.broadcast %cst_10 : f32 to vector<16x1xf32>
    %32 = arith.mulf %30, %31 : vector<16x1xf32>
    %33 = arith.mulf %26, %26 : vector<16x128xf32>
    %cst_11 = arith.constant dense<0.000000e+00> : vector<16xf32>
    %34 = vector.multi_reduction <add>, %33, %cst_11 [1] : vector<16x128xf32> to vector<16xf32>
    %35 = vector.shape_cast %34 : vector<16xf32> to vector<16x1xf32>
    %cst_12 = arith.constant 3.125000e-02 : f32
    %36 = vector.broadcast %cst_12 : f32 to vector<16x1xf32>
    %37 = arith.mulf %35, %36 : vector<16x1xf32>
    %38 = arith.mulf %32, %32 : vector<16x1xf32>
    %39 = arith.subf %37, %38 : vector<16x1xf32>
    %40 = vector.broadcast %32 : vector<16x1xf32> to vector<16x128xf32>
    %41 = arith.subf %26, %40 : vector<16x128xf32>
    %cst_13 = arith.constant 9.99999974E-6 : f32
    %42 = vector.broadcast %cst_13 : f32 to vector<16x1xf32>
    %43 = arith.addf %39, %42 : vector<16x1xf32>
    %44 = math.rsqrt %43 : vector<16x1xf32>
    %45 = vector.broadcast %44 : vector<16x1xf32> to vector<16x128xf32>
    %46 = arith.mulf %41, %45 : vector<16x128xf32>
    %47 = vector.broadcast %27 : vector<1x128xf32> to vector<16x128xf32>
    %48 = arith.mulf %46, %47 : vector<16x128xf32>
    %49 = vector.broadcast %28 : vector<1x128xf32> to vector<16x128xf32>
    %50 = arith.addf %48, %49 : vector<16x128xf32>
    %c0_14 = arith.constant 0 : index
    %c0_15 = arith.constant 0 : index
    %c0_16 = arith.constant 0 : index
    %51 = vector.load %arg9[%c0_14, %c0_15, %c0_16] : memref<2x10x128xf32, #tpu.memory_space<vmem>>, vector<1x10x128xf32>
    %52 = vector.shape_cast %51 : vector<1x10x128xf32> to vector<10x128xf32>
    %53 = vector.extract_strided_slice %52 {offsets = [0, 0], sizes = [1, 128], strides = [1, 1]} : vector<10x128xf32> to vector<1x128xf32>
    %54 = vector.extract_strided_slice %52 {offsets = [1, 0], sizes = [1, 128], strides = [1, 1]} : vector<10x128xf32> to vector<1x128xf32>
    %cst_17 = arith.constant dense<0.000000e+00> : vector<16xf32>
    %55 = vector.multi_reduction <add>, %50, %cst_17 [1] : vector<16x128xf32> to vector<16xf32>
    %56 = vector.shape_cast %55 : vector<16xf32> to vector<16x1xf32>
    %cst_18 = arith.constant 3.125000e-02 : f32
    %57 = vector.broadcast %cst_18 : f32 to vector<16x1xf32>
    %58 = arith.mulf %56, %57 : vector<16x1xf32>
    %59 = arith.mulf %50, %50 : vector<16x128xf32>
    %cst_19 = arith.constant dense<0.000000e+00> : vector<16xf32>
    %60 = vector.multi_reduction <add>, %59, %cst_19 [1] : vector<16x128xf32> to vector<16xf32>
    %61 = vector.shape_cast %60 : vector<16xf32> to vector<16x1xf32>
    %cst_20 = arith.constant 3.125000e-02 : f32
    %62 = vector.broadcast %cst_20 : f32 to vector<16x1xf32>
    %63 = arith.mulf %61, %62 : vector<16x1xf32>
    %64 = arith.mulf %58, %58 : vector<16x1xf32>
    %65 = arith.subf %63, %64 : vector<16x1xf32>
    %66 = vector.broadcast %58 : vector<16x1xf32> to vector<16x128xf32>
    %67 = arith.subf %50, %66 : vector<16x128xf32>
    %cst_21 = arith.constant 9.99999974E-6 : f32
    %68 = vector.broadcast %cst_21 : f32 to vector<16x1xf32>
    %69 = arith.addf %65, %68 : vector<16x1xf32>
    %70 = math.rsqrt %69 : vector<16x1xf32>
    %71 = vector.broadcast %70 : vector<16x1xf32> to vector<16x128xf32>
    %72 = arith.mulf %67, %71 : vector<16x128xf32>
    %73 = vector.broadcast %53 : vector<1x128xf32> to vector<16x128xf32>
    %74 = arith.mulf %72, %73 : vector<16x128xf32>
    %75 = vector.broadcast %54 : vector<1x128xf32> to vector<16x128xf32>
    %76 = arith.addf %74, %75 : vector<16x128xf32>
    %77 = arith.truncf %76 : vector<16x128xf32> to vector<16x128xbf16>
    %c0_22 = arith.constant 0 : index
    %c0_23 = arith.constant 0 : index
    %c0_24 = arith.constant 0 : index
    %78 = vector.load %arg5[%c0_22, %c0_23, %c0_24] : memref<2x128x384xbf16, #tpu.memory_space<vmem>>, vector<1x128x384xbf16>
    %79 = vector.shape_cast %78 : vector<1x128x384xbf16> to vector<128x384xbf16>
    %cst_25 = arith.constant dense<0.000000e+00> : vector<16x384xf32>
    %80 = tpu.matmul %77, %79, %cst_25 {dimension_numbers = #tpu.dot_dimension_numbers<[1], [0], [0], [1], [0, 0, 1, 1], [], []>} : vector<16x128xbf16>, vector<128x384xbf16>, vector<16x384xf32> -> vector<16x384xf32>
    %81 = vector.extract_strided_slice %80 {offsets = [0, 0], sizes = [16, 128], strides = [1, 1]} : vector<16x384xf32> to vector<16x128xf32>
    %82 = vector.extract_strided_slice %52 {offsets = [6, 0], sizes = [1, 128], strides = [1, 1]} : vector<10x128xf32> to vector<1x128xf32>
    %83 = vector.broadcast %82 : vector<1x128xf32> to vector<16x128xf32>
    %84 = arith.addf %81, %83 : vector<16x128xf32>
    %cst_26 = arith.constant 0.353553385 : f32
    %85 = vector.broadcast %cst_26 : f32 to vector<16x128xf32>
    %86 = arith.mulf %84, %85 : vector<16x128xf32>
    %87 = vector.extract_strided_slice %80 {offsets = [0, 128], sizes = [16, 128], strides = [1, 1]} : vector<16x384xf32> to vector<16x128xf32>
    %88 = vector.extract_strided_slice %52 {offsets = [7, 0], sizes = [1, 128], strides = [1, 1]} : vector<10x128xf32> to vector<1x128xf32>
    %89 = vector.broadcast %88 : vector<1x128xf32> to vector<16x128xf32>
    %90 = arith.addf %87, %89 : vector<16x128xf32>
    %91 = arith.truncf %90 : vector<16x128xf32> to vector<16x128xbf16>
    %92 = vector.extract_strided_slice %80 {offsets = [0, 256], sizes = [16, 128], strides = [1, 1]} : vector<16x384xf32> to vector<16x128xf32>
    %93 = vector.extract_strided_slice %52 {offsets = [8, 0], sizes = [1, 128], strides = [1, 1]} : vector<10x128xf32> to vector<1x128xf32>
    %94 = vector.broadcast %93 : vector<1x128xf32> to vector<16x128xf32>
    %95 = arith.addf %92, %94 : vector<16x128xf32>
    %96 = arith.truncf %95 : vector<16x128xf32> to vector<16x128xbf16>
    %97 = vector.extract_strided_slice %86 {offsets = [0, 0], sizes = [8, 128], strides = [1, 1]} : vector<16x128xf32> to vector<8x128xf32>
    %98 = vector.shape_cast %97 : vector<8x128xf32> to vector<1x8x128xf32>
    %99 = vector.broadcast %98 : vector<1x8x128xf32> to vector<4x8x128xf32>
    %100 = vector.broadcast %12 : vector<4x1x128xf32> to vector<4x8x128xf32>
    %101 = arith.mulf %99, %100 : vector<4x8x128xf32>
    %102 = arith.truncf %101 : vector<4x8x128xf32> to vector<4x8x128xbf16>
    %103 = vector.shape_cast %102 : vector<4x8x128xbf16> to vector<32x128xbf16>
    %104 = vector.extract_strided_slice %91 {offsets = [0, 0], sizes = [8, 128], strides = [1, 1]} : vector<16x128xbf16> to vector<8x128xbf16>
    %105 = vector.extract_strided_slice %96 {offsets = [0, 0], sizes = [8, 128], strides = [1, 1]} : vector<16x128xbf16> to vector<8x128xbf16>
    %cst_27 = arith.constant dense<0.000000e+00> : vector<32x8xf32>
    %106 = tpu.matmul %103, %104, %cst_27 {dimension_numbers = #tpu.dot_dimension_numbers<[1], [1], [0], [0], [0, 0, 1, 0], [], []>} : vector<32x128xbf16>, vector<8x128xbf16>, vector<32x8xf32> -> vector<32x8xf32>
    %cst_28 = arith.constant -1.000000e+30 : f32
    %107 = vector.shape_cast %15 : vector<1x8xi1> to vector<1x8xi1>
    %108 = vector.broadcast %107 : vector<1x8xi1> to vector<32x8xi1>
    %109 = vector.broadcast %cst_28 : f32 to vector<32x8xf32>
    %110 = arith.select %108, %106, %109 : vector<32x8xi1>, vector<32x8xf32>
    %cst_29 = arith.constant dense<0xFF800000> : vector<32xf32>
    %111 = vector.multi_reduction <maximumf>, %110, %cst_29 [1] : vector<32x8xf32> to vector<32xf32>
    %112 = vector.shape_cast %111 : vector<32xf32> to vector<32x1xf32>
    %113 = vector.broadcast %112 : vector<32x1xf32> to vector<32x8xf32>
    %114 = arith.subf %110, %113 : vector<32x8xf32>
    %115 = math.exp %114 : vector<32x8xf32>
    %cst_30 = arith.constant dense<0.000000e+00> : vector<32xf32>
    %116 = vector.multi_reduction <add>, %115, %cst_30 [1] : vector<32x8xf32> to vector<32xf32>
    %117 = vector.shape_cast %116 : vector<32xf32> to vector<32x1xf32>
    %118 = tpu.reciprocal %117 {approx = true} : vector<32x1xf32> -> vector<32x1xf32>
    %119 = vector.broadcast %118 : vector<32x1xf32> to vector<32x8xf32>
    %120 = arith.mulf %115, %119 : vector<32x8xf32>
    %121 = arith.truncf %120 : vector<32x8xf32> to vector<32x8xbf16>
    %cst_31 = arith.constant dense<0.000000e+00> : vector<32x128xf32>
    %122 = tpu.matmul %121, %105, %cst_31 {dimension_numbers = #tpu.dot_dimension_numbers<[1], [0], [0], [1], [0, 0, 1, 1], [], []>} : vector<32x8xbf16>, vector<8x128xbf16>, vector<32x128xf32> -> vector<32x128xf32>
    %123 = vector.shape_cast %122 : vector<32x128xf32> to vector<4x8x128xf32>
    %124 = vector.broadcast %12 : vector<4x1x128xf32> to vector<4x8x128xf32>
    %125 = arith.mulf %123, %124 : vector<4x8x128xf32>
    %cst_32 = arith.constant dense<0.000000e+00> : vector<8x128xf32>
    %126 = vector.multi_reduction <add>, %125, %cst_32 [0] : vector<4x8x128xf32> to vector<8x128xf32>
    %127 = vector.extract_strided_slice %86 {offsets = [8, 0], sizes = [8, 128], strides = [1, 1]} : vector<16x128xf32> to vector<8x128xf32>
    %128 = vector.shape_cast %127 : vector<8x128xf32> to vector<1x8x128xf32>
    %129 = vector.broadcast %128 : vector<1x8x128xf32> to vector<4x8x128xf32>
    %130 = vector.broadcast %12 : vector<4x1x128xf32> to vector<4x8x128xf32>
    %131 = arith.mulf %129, %130 : vector<4x8x128xf32>
    %132 = arith.truncf %131 : vector<4x8x128xf32> to vector<4x8x128xbf16>
    %133 = vector.shape_cast %132 : vector<4x8x128xbf16> to vector<32x128xbf16>
    %134 = vector.extract_strided_slice %91 {offsets = [8, 0], sizes = [8, 128], strides = [1, 1]} : vector<16x128xbf16> to vector<8x128xbf16>
    %135 = vector.extract_strided_slice %96 {offsets = [8, 0], sizes = [8, 128], strides = [1, 1]} : vector<16x128xbf16> to vector<8x128xbf16>
    %cst_33 = arith.constant dense<0.000000e+00> : vector<32x8xf32>
    %136 = tpu.matmul %133, %134, %cst_33 {dimension_numbers = #tpu.dot_dimension_numbers<[1], [1], [0], [0], [0, 0, 1, 0], [], []>} : vector<32x128xbf16>, vector<8x128xbf16>, vector<32x8xf32> -> vector<32x8xf32>
    %cst_34 = arith.constant -1.000000e+30 : f32
    %137 = vector.shape_cast %15 : vector<1x8xi1> to vector<1x8xi1>
    %138 = vector.broadcast %137 : vector<1x8xi1> to vector<32x8xi1>
    %139 = vector.broadcast %cst_34 : f32 to vector<32x8xf32>
    %140 = arith.select %138, %136, %139 : vector<32x8xi1>, vector<32x8xf32>
    %cst_35 = arith.constant dense<0xFF800000> : vector<32xf32>
    %141 = vector.multi_reduction <maximumf>, %140, %cst_35 [1] : vector<32x8xf32> to vector<32xf32>
    %142 = vector.shape_cast %141 : vector<32xf32> to vector<32x1xf32>
    %143 = vector.broadcast %142 : vector<32x1xf32> to vector<32x8xf32>
    %144 = arith.subf %140, %143 : vector<32x8xf32>
    %145 = math.exp %144 : vector<32x8xf32>
    %cst_36 = arith.constant dense<0.000000e+00> : vector<32xf32>
    %146 = vector.multi_reduction <add>, %145, %cst_36 [1] : vector<32x8xf32> to vector<32xf32>
    %147 = vector.shape_cast %146 : vector<32xf32> to vector<32x1xf32>
    %148 = tpu.reciprocal %147 {approx = true} : vector<32x1xf32> -> vector<32x1xf32>
    %149 = vector.broadcast %148 : vector<32x1xf32> to vector<32x8xf32>
    %150 = arith.mulf %145, %149 : vector<32x8xf32>
    %151 = arith.truncf %150 : vector<32x8xf32> to vector<32x8xbf16>
    %cst_37 = arith.constant dense<0.000000e+00> : vector<32x128xf32>
    %152 = tpu.matmul %151, %135, %cst_37 {dimension_numbers = #tpu.dot_dimension_numbers<[1], [0], [0], [1], [0, 0, 1, 1], [], []>} : vector<32x8xbf16>, vector<8x128xbf16>, vector<32x128xf32> -> vector<32x128xf32>
    %153 = vector.shape_cast %152 : vector<32x128xf32> to vector<4x8x128xf32>
    %154 = vector.broadcast %12 : vector<4x1x128xf32> to vector<4x8x128xf32>
    %155 = arith.mulf %153, %154 : vector<4x8x128xf32>
    %cst_38 = arith.constant dense<0.000000e+00> : vector<8x128xf32>
    %156 = vector.multi_reduction <add>, %155, %cst_38 [0] : vector<4x8x128xf32> to vector<8x128xf32>
    %157 = tpu.concatenate %126, %156 in 0 : vector<8x128xf32>, vector<8x128xf32> -> vector<16x128xf32>
    %158 = arith.truncf %157 : vector<16x128xf32> to vector<16x128xbf16>
    %c0_39 = arith.constant 0 : index
    %c0_40 = arith.constant 0 : index
    %c0_41 = arith.constant 0 : index
    %159 = vector.load %arg6[%c0_39, %c0_40, %c0_41] : memref<2x128x128xbf16, #tpu.memory_space<vmem>>, vector<1x128x128xbf16>
    %160 = vector.shape_cast %159 : vector<1x128x128xbf16> to vector<128x128xbf16>
    %cst_42 = arith.constant dense<0.000000e+00> : vector<16x128xf32>
    %161 = tpu.matmul %158, %160, %cst_42 {dimension_numbers = #tpu.dot_dimension_numbers<[1], [0], [0], [1], [0, 0, 1, 1], [], []>} : vector<16x128xbf16>, vector<128x128xbf16>, vector<16x128xf32> -> vector<16x128xf32>
    %162 = arith.addf %50, %161 : vector<16x128xf32>
    %163 = vector.extract_strided_slice %52 {offsets = [4, 0], sizes = [1, 128], strides = [1, 1]} : vector<10x128xf32> to vector<1x128xf32>
    %164 = vector.broadcast %163 : vector<1x128xf32> to vector<16x128xf32>
    %165 = arith.addf %162, %164 : vector<16x128xf32>
    %166 = vector.extract_strided_slice %52 {offsets = [2, 0], sizes = [1, 128], strides = [1, 1]} : vector<10x128xf32> to vector<1x128xf32>
    %167 = vector.extract_strided_slice %52 {offsets = [3, 0], sizes = [1, 128], strides = [1, 1]} : vector<10x128xf32> to vector<1x128xf32>
    %cst_43 = arith.constant dense<0.000000e+00> : vector<16xf32>
    %168 = vector.multi_reduction <add>, %165, %cst_43 [1] : vector<16x128xf32> to vector<16xf32>
    %169 = vector.shape_cast %168 : vector<16xf32> to vector<16x1xf32>
    %cst_44 = arith.constant 3.125000e-02 : f32
    %170 = vector.broadcast %cst_44 : f32 to vector<16x1xf32>
    %171 = arith.mulf %169, %170 : vector<16x1xf32>
    %172 = arith.mulf %165, %165 : vector<16x128xf32>
    %cst_45 = arith.constant dense<0.000000e+00> : vector<16xf32>
    %173 = vector.multi_reduction <add>, %172, %cst_45 [1] : vector<16x128xf32> to vector<16xf32>
    %174 = vector.shape_cast %173 : vector<16xf32> to vector<16x1xf32>
    %cst_46 = arith.constant 3.125000e-02 : f32
    %175 = vector.broadcast %cst_46 : f32 to vector<16x1xf32>
    %176 = arith.mulf %174, %175 : vector<16x1xf32>
    %177 = arith.mulf %171, %171 : vector<16x1xf32>
    %178 = arith.subf %176, %177 : vector<16x1xf32>
    %179 = vector.broadcast %171 : vector<16x1xf32> to vector<16x128xf32>
    %180 = arith.subf %165, %179 : vector<16x128xf32>
    %cst_47 = arith.constant 9.99999974E-6 : f32
    %181 = vector.broadcast %cst_47 : f32 to vector<16x1xf32>
    %182 = arith.addf %178, %181 : vector<16x1xf32>
    %183 = math.rsqrt %182 : vector<16x1xf32>
    %184 = vector.broadcast %183 : vector<16x1xf32> to vector<16x128xf32>
    %185 = arith.mulf %180, %184 : vector<16x128xf32>
    %186 = vector.broadcast %166 : vector<1x128xf32> to vector<16x128xf32>
    %187 = arith.mulf %185, %186 : vector<16x128xf32>
    %188 = vector.broadcast %167 : vector<1x128xf32> to vector<16x128xf32>
    %189 = arith.addf %187, %188 : vector<16x128xf32>
    %190 = arith.truncf %189 : vector<16x128xf32> to vector<16x128xbf16>
    %c0_48 = arith.constant 0 : index
    %c0_49 = arith.constant 0 : index
    %c0_50 = arith.constant 0 : index
    %191 = vector.load %arg7[%c0_48, %c0_49, %c0_50] : memref<2x128x128xbf16, #tpu.memory_space<vmem>>, vector<1x128x128xbf16>
    %192 = vector.shape_cast %191 : vector<1x128x128xbf16> to vector<128x128xbf16>
    %cst_51 = arith.constant dense<0.000000e+00> : vector<16x128xf32>
    %193 = tpu.matmul %190, %192, %cst_51 {dimension_numbers = #tpu.dot_dimension_numbers<[1], [0], [0], [1], [0, 0, 1, 1], [], []>} : vector<16x128xbf16>, vector<128x128xbf16>, vector<16x128xf32> -> vector<16x128xf32>
    %194 = vector.extract_strided_slice %52 {offsets = [9, 0], sizes = [1, 128], strides = [1, 1]} : vector<10x128xf32> to vector<1x128xf32>
    %195 = vector.broadcast %194 : vector<1x128xf32> to vector<16x128xf32>
    %196 = arith.addf %193, %195 : vector<16x128xf32>
    %cst_52 = arith.constant 1.702000e+00 : f32
    %197 = vector.broadcast %cst_52 : f32 to vector<16x128xf32>
    %198 = arith.mulf %197, %196 : vector<16x128xf32>
    %199 = arith.negf %198 : vector<16x128xf32>
    %200 = math.exp %199 : vector<16x128xf32>
    %cst_53 = arith.constant 1.000000e+00 : f32
    %201 = vector.broadcast %cst_53 : f32 to vector<16x128xf32>
    %202 = arith.addf %201, %200 : vector<16x128xf32>
    %203 = arith.divf %201, %202 : vector<16x128xf32>
    %204 = arith.mulf %196, %203 : vector<16x128xf32>
    %205 = arith.truncf %204 : vector<16x128xf32> to vector<16x128xbf16>
    %c0_54 = arith.constant 0 : index
    %c0_55 = arith.constant 0 : index
    %c0_56 = arith.constant 0 : index
    %206 = vector.load %arg8[%c0_54, %c0_55, %c0_56] : memref<2x128x128xbf16, #tpu.memory_space<vmem>>, vector<1x128x128xbf16>
    %207 = vector.shape_cast %206 : vector<1x128x128xbf16> to vector<128x128xbf16>
    %cst_57 = arith.constant dense<0.000000e+00> : vector<16x128xf32>
    %208 = tpu.matmul %205, %207, %cst_57 {dimension_numbers = #tpu.dot_dimension_numbers<[1], [0], [0], [1], [0, 0, 1, 1], [], []>} : vector<16x128xbf16>, vector<128x128xbf16>, vector<16x128xf32> -> vector<16x128xf32>
    %209 = arith.addf %165, %208 : vector<16x128xf32>
    %210 = vector.extract_strided_slice %52 {offsets = [5, 0], sizes = [1, 128], strides = [1, 1]} : vector<10x128xf32> to vector<1x128xf32>
    %211 = vector.broadcast %210 : vector<1x128xf32> to vector<16x128xf32>
    %212 = arith.addf %209, %211 : vector<16x128xf32>
    %c1 = arith.constant 1 : index
    %c0_58 = arith.constant 0 : index
    %c0_59 = arith.constant 0 : index
    %213 = vector.load %arg9[%c1, %c0_58, %c0_59] : memref<2x10x128xf32, #tpu.memory_space<vmem>>, vector<1x10x128xf32>
    %214 = vector.shape_cast %213 : vector<1x10x128xf32> to vector<10x128xf32>
    %215 = vector.extract_strided_slice %214 {offsets = [0, 0], sizes = [1, 128], strides = [1, 1]} : vector<10x128xf32> to vector<1x128xf32>
    %216 = vector.extract_strided_slice %214 {offsets = [1, 0], sizes = [1, 128], strides = [1, 1]} : vector<10x128xf32> to vector<1x128xf32>
    %cst_60 = arith.constant dense<0.000000e+00> : vector<16xf32>
    %217 = vector.multi_reduction <add>, %212, %cst_60 [1] : vector<16x128xf32> to vector<16xf32>
    %218 = vector.shape_cast %217 : vector<16xf32> to vector<16x1xf32>
    %cst_61 = arith.constant 3.125000e-02 : f32
    %219 = vector.broadcast %cst_61 : f32 to vector<16x1xf32>
    %220 = arith.mulf %218, %219 : vector<16x1xf32>
    %221 = arith.mulf %212, %212 : vector<16x128xf32>
    %cst_62 = arith.constant dense<0.000000e+00> : vector<16xf32>
    %222 = vector.multi_reduction <add>, %221, %cst_62 [1] : vector<16x128xf32> to vector<16xf32>
    %223 = vector.shape_cast %222 : vector<16xf32> to vector<16x1xf32>
    %cst_63 = arith.constant 3.125000e-02 : f32
    %224 = vector.broadcast %cst_63 : f32 to vector<16x1xf32>
    %225 = arith.mulf %223, %224 : vector<16x1xf32>
    %226 = arith.mulf %220, %220 : vector<16x1xf32>
    %227 = arith.subf %225, %226 : vector<16x1xf32>
    %228 = vector.broadcast %220 : vector<16x1xf32> to vector<16x128xf32>
    %229 = arith.subf %212, %228 : vector<16x128xf32>
    %cst_64 = arith.constant 9.99999974E-6 : f32
    %230 = vector.broadcast %cst_64 : f32 to vector<16x1xf32>
    %231 = arith.addf %227, %230 : vector<16x1xf32>
    %232 = math.rsqrt %231 : vector<16x1xf32>
    %233 = vector.broadcast %232 : vector<16x1xf32> to vector<16x128xf32>
    %234 = arith.mulf %229, %233 : vector<16x128xf32>
    %235 = vector.broadcast %215 : vector<1x128xf32> to vector<16x128xf32>
    %236 = arith.mulf %234, %235 : vector<16x128xf32>
    %237 = vector.broadcast %216 : vector<1x128xf32> to vector<16x128xf32>
    %238 = arith.addf %236, %237 : vector<16x128xf32>
    %239 = arith.truncf %238 : vector<16x128xf32> to vector<16x128xbf16>
    %c1_65 = arith.constant 1 : index
    %c0_66 = arith.constant 0 : index
    %c0_67 = arith.constant 0 : index
    %240 = vector.load %arg5[%c1_65, %c0_66, %c0_67] : memref<2x128x384xbf16, #tpu.memory_space<vmem>>, vector<1x128x384xbf16>
    %241 = vector.shape_cast %240 : vector<1x128x384xbf16> to vector<128x384xbf16>
    %cst_68 = arith.constant dense<0.000000e+00> : vector<16x384xf32>
    %242 = tpu.matmul %239, %241, %cst_68 {dimension_numbers = #tpu.dot_dimension_numbers<[1], [0], [0], [1], [0, 0, 1, 1], [], []>} : vector<16x128xbf16>, vector<128x384xbf16>, vector<16x384xf32> -> vector<16x384xf32>
    %243 = vector.extract_strided_slice %242 {offsets = [0, 0], sizes = [16, 128], strides = [1, 1]} : vector<16x384xf32> to vector<16x128xf32>
    %244 = vector.extract_strided_slice %214 {offsets = [6, 0], sizes = [1, 128], strides = [1, 1]} : vector<10x128xf32> to vector<1x128xf32>
    %245 = vector.broadcast %244 : vector<1x128xf32> to vector<16x128xf32>
    %246 = arith.addf %243, %245 : vector<16x128xf32>
    %cst_69 = arith.constant 0.353553385 : f32
    %247 = vector.broadcast %cst_69 : f32 to vector<16x128xf32>
    %248 = arith.mulf %246, %247 : vector<16x128xf32>
    %249 = vector.extract_strided_slice %242 {offsets = [0, 128], sizes = [16, 128], strides = [1, 1]} : vector<16x384xf32> to vector<16x128xf32>
    %250 = vector.extract_strided_slice %214 {offsets = [7, 0], sizes = [1, 128], strides = [1, 1]} : vector<10x128xf32> to vector<1x128xf32>
    %251 = vector.broadcast %250 : vector<1x128xf32> to vector<16x128xf32>
    %252 = arith.addf %249, %251 : vector<16x128xf32>
    %253 = arith.truncf %252 : vector<16x128xf32> to vector<16x128xbf16>
    %254 = vector.extract_strided_slice %242 {offsets = [0, 256], sizes = [16, 128], strides = [1, 1]} : vector<16x384xf32> to vector<16x128xf32>
    %255 = vector.extract_strided_slice %214 {offsets = [8, 0], sizes = [1, 128], strides = [1, 1]} : vector<10x128xf32> to vector<1x128xf32>
    %256 = vector.broadcast %255 : vector<1x128xf32> to vector<16x128xf32>
    %257 = arith.addf %254, %256 : vector<16x128xf32>
    %258 = arith.truncf %257 : vector<16x128xf32> to vector<16x128xbf16>
    %259 = vector.extract_strided_slice %248 {offsets = [0, 0], sizes = [8, 128], strides = [1, 1]} : vector<16x128xf32> to vector<8x128xf32>
    %260 = vector.shape_cast %259 : vector<8x128xf32> to vector<1x8x128xf32>
    %261 = vector.broadcast %260 : vector<1x8x128xf32> to vector<4x8x128xf32>
    %262 = vector.broadcast %12 : vector<4x1x128xf32> to vector<4x8x128xf32>
    %263 = arith.mulf %261, %262 : vector<4x8x128xf32>
    %264 = arith.truncf %263 : vector<4x8x128xf32> to vector<4x8x128xbf16>
    %265 = vector.shape_cast %264 : vector<4x8x128xbf16> to vector<32x128xbf16>
    %266 = vector.extract_strided_slice %253 {offsets = [0, 0], sizes = [8, 128], strides = [1, 1]} : vector<16x128xbf16> to vector<8x128xbf16>
    %267 = vector.extract_strided_slice %258 {offsets = [0, 0], sizes = [8, 128], strides = [1, 1]} : vector<16x128xbf16> to vector<8x128xbf16>
    %cst_70 = arith.constant dense<0.000000e+00> : vector<32x8xf32>
    %268 = tpu.matmul %265, %266, %cst_70 {dimension_numbers = #tpu.dot_dimension_numbers<[1], [1], [0], [0], [0, 0, 1, 0], [], []>} : vector<32x128xbf16>, vector<8x128xbf16>, vector<32x8xf32> -> vector<32x8xf32>
    %cst_71 = arith.constant -1.000000e+30 : f32
    %269 = vector.shape_cast %15 : vector<1x8xi1> to vector<1x8xi1>
    %270 = vector.broadcast %269 : vector<1x8xi1> to vector<32x8xi1>
    %271 = vector.broadcast %cst_71 : f32 to vector<32x8xf32>
    %272 = arith.select %270, %268, %271 : vector<32x8xi1>, vector<32x8xf32>
    %cst_72 = arith.constant dense<0xFF800000> : vector<32xf32>
    %273 = vector.multi_reduction <maximumf>, %272, %cst_72 [1] : vector<32x8xf32> to vector<32xf32>
    %274 = vector.shape_cast %273 : vector<32xf32> to vector<32x1xf32>
    %275 = vector.broadcast %274 : vector<32x1xf32> to vector<32x8xf32>
    %276 = arith.subf %272, %275 : vector<32x8xf32>
    %277 = math.exp %276 : vector<32x8xf32>
    %cst_73 = arith.constant dense<0.000000e+00> : vector<32xf32>
    %278 = vector.multi_reduction <add>, %277, %cst_73 [1] : vector<32x8xf32> to vector<32xf32>
    %279 = vector.shape_cast %278 : vector<32xf32> to vector<32x1xf32>
    %280 = tpu.reciprocal %279 {approx = true} : vector<32x1xf32> -> vector<32x1xf32>
    %281 = vector.broadcast %280 : vector<32x1xf32> to vector<32x8xf32>
    %282 = arith.mulf %277, %281 : vector<32x8xf32>
    %283 = arith.truncf %282 : vector<32x8xf32> to vector<32x8xbf16>
    %cst_74 = arith.constant dense<0.000000e+00> : vector<32x128xf32>
    %284 = tpu.matmul %283, %267, %cst_74 {dimension_numbers = #tpu.dot_dimension_numbers<[1], [0], [0], [1], [0, 0, 1, 1], [], []>} : vector<32x8xbf16>, vector<8x128xbf16>, vector<32x128xf32> -> vector<32x128xf32>
    %285 = vector.shape_cast %284 : vector<32x128xf32> to vector<4x8x128xf32>
    %286 = vector.broadcast %12 : vector<4x1x128xf32> to vector<4x8x128xf32>
    %287 = arith.mulf %285, %286 : vector<4x8x128xf32>
    %cst_75 = arith.constant dense<0.000000e+00> : vector<8x128xf32>
    %288 = vector.multi_reduction <add>, %287, %cst_75 [0] : vector<4x8x128xf32> to vector<8x128xf32>
    %289 = vector.extract_strided_slice %248 {offsets = [8, 0], sizes = [8, 128], strides = [1, 1]} : vector<16x128xf32> to vector<8x128xf32>
    %290 = vector.shape_cast %289 : vector<8x128xf32> to vector<1x8x128xf32>
    %291 = vector.broadcast %290 : vector<1x8x128xf32> to vector<4x8x128xf32>
    %292 = vector.broadcast %12 : vector<4x1x128xf32> to vector<4x8x128xf32>
    %293 = arith.mulf %291, %292 : vector<4x8x128xf32>
    %294 = arith.truncf %293 : vector<4x8x128xf32> to vector<4x8x128xbf16>
    %295 = vector.shape_cast %294 : vector<4x8x128xbf16> to vector<32x128xbf16>
    %296 = vector.extract_strided_slice %253 {offsets = [8, 0], sizes = [8, 128], strides = [1, 1]} : vector<16x128xbf16> to vector<8x128xbf16>
    %297 = vector.extract_strided_slice %258 {offsets = [8, 0], sizes = [8, 128], strides = [1, 1]} : vector<16x128xbf16> to vector<8x128xbf16>
    %cst_76 = arith.constant dense<0.000000e+00> : vector<32x8xf32>
    %298 = tpu.matmul %295, %296, %cst_76 {dimension_numbers = #tpu.dot_dimension_numbers<[1], [1], [0], [0], [0, 0, 1, 0], [], []>} : vector<32x128xbf16>, vector<8x128xbf16>, vector<32x8xf32> -> vector<32x8xf32>
    %cst_77 = arith.constant -1.000000e+30 : f32
    %299 = vector.shape_cast %15 : vector<1x8xi1> to vector<1x8xi1>
    %300 = vector.broadcast %299 : vector<1x8xi1> to vector<32x8xi1>
    %301 = vector.broadcast %cst_77 : f32 to vector<32x8xf32>
    %302 = arith.select %300, %298, %301 : vector<32x8xi1>, vector<32x8xf32>
    %cst_78 = arith.constant dense<0xFF800000> : vector<32xf32>
    %303 = vector.multi_reduction <maximumf>, %302, %cst_78 [1] : vector<32x8xf32> to vector<32xf32>
    %304 = vector.shape_cast %303 : vector<32xf32> to vector<32x1xf32>
    %305 = vector.broadcast %304 : vector<32x1xf32> to vector<32x8xf32>
    %306 = arith.subf %302, %305 : vector<32x8xf32>
    %307 = math.exp %306 : vector<32x8xf32>
    %cst_79 = arith.constant dense<0.000000e+00> : vector<32xf32>
    %308 = vector.multi_reduction <add>, %307, %cst_79 [1] : vector<32x8xf32> to vector<32xf32>
    %309 = vector.shape_cast %308 : vector<32xf32> to vector<32x1xf32>
    %310 = tpu.reciprocal %309 {approx = true} : vector<32x1xf32> -> vector<32x1xf32>
    %311 = vector.broadcast %310 : vector<32x1xf32> to vector<32x8xf32>
    %312 = arith.mulf %307, %311 : vector<32x8xf32>
    %313 = arith.truncf %312 : vector<32x8xf32> to vector<32x8xbf16>
    %cst_80 = arith.constant dense<0.000000e+00> : vector<32x128xf32>
    %314 = tpu.matmul %313, %297, %cst_80 {dimension_numbers = #tpu.dot_dimension_numbers<[1], [0], [0], [1], [0, 0, 1, 1], [], []>} : vector<32x8xbf16>, vector<8x128xbf16>, vector<32x128xf32> -> vector<32x128xf32>
    %315 = vector.shape_cast %314 : vector<32x128xf32> to vector<4x8x128xf32>
    %316 = vector.broadcast %12 : vector<4x1x128xf32> to vector<4x8x128xf32>
    %317 = arith.mulf %315, %316 : vector<4x8x128xf32>
    %cst_81 = arith.constant dense<0.000000e+00> : vector<8x128xf32>
    %318 = vector.multi_reduction <add>, %317, %cst_81 [0] : vector<4x8x128xf32> to vector<8x128xf32>
    %319 = tpu.concatenate %288, %318 in 0 : vector<8x128xf32>, vector<8x128xf32> -> vector<16x128xf32>
    %320 = arith.truncf %319 : vector<16x128xf32> to vector<16x128xbf16>
    %c1_82 = arith.constant 1 : index
    %c0_83 = arith.constant 0 : index
    %c0_84 = arith.constant 0 : index
    %321 = vector.load %arg6[%c1_82, %c0_83, %c0_84] : memref<2x128x128xbf16, #tpu.memory_space<vmem>>, vector<1x128x128xbf16>
    %322 = vector.shape_cast %321 : vector<1x128x128xbf16> to vector<128x128xbf16>
    %cst_85 = arith.constant dense<0.000000e+00> : vector<16x128xf32>
    %323 = tpu.matmul %320, %322, %cst_85 {dimension_numbers = #tpu.dot_dimension_numbers<[1], [0], [0], [1], [0, 0, 1, 1], [], []>} : vector<16x128xbf16>, vector<128x128xbf16>, vector<16x128xf32> -> vector<16x128xf32>
    %324 = arith.addf %212, %323 : vector<16x128xf32>
    %325 = vector.extract_strided_slice %214 {offsets = [4, 0], sizes = [1, 128], strides = [1, 1]} : vector<10x128xf32> to vector<1x128xf32>
    %326 = vector.broadcast %325 : vector<1x128xf32> to vector<16x128xf32>
    %327 = arith.addf %324, %326 : vector<16x128xf32>
    %328 = vector.extract_strided_slice %214 {offsets = [2, 0], sizes = [1, 128], strides = [1, 1]} : vector<10x128xf32> to vector<1x128xf32>
    %329 = vector.extract_strided_slice %214 {offsets = [3, 0], sizes = [1, 128], strides = [1, 1]} : vector<10x128xf32> to vector<1x128xf32>
    %cst_86 = arith.constant dense<0.000000e+00> : vector<16xf32>
    %330 = vector.multi_reduction <add>, %327, %cst_86 [1] : vector<16x128xf32> to vector<16xf32>
    %331 = vector.shape_cast %330 : vector<16xf32> to vector<16x1xf32>
    %cst_87 = arith.constant 3.125000e-02 : f32
    %332 = vector.broadcast %cst_87 : f32 to vector<16x1xf32>
    %333 = arith.mulf %331, %332 : vector<16x1xf32>
    %334 = arith.mulf %327, %327 : vector<16x128xf32>
    %cst_88 = arith.constant dense<0.000000e+00> : vector<16xf32>
    %335 = vector.multi_reduction <add>, %334, %cst_88 [1] : vector<16x128xf32> to vector<16xf32>
    %336 = vector.shape_cast %335 : vector<16xf32> to vector<16x1xf32>
    %cst_89 = arith.constant 3.125000e-02 : f32
    %337 = vector.broadcast %cst_89 : f32 to vector<16x1xf32>
    %338 = arith.mulf %336, %337 : vector<16x1xf32>
    %339 = arith.mulf %333, %333 : vector<16x1xf32>
    %340 = arith.subf %338, %339 : vector<16x1xf32>
    %341 = vector.broadcast %333 : vector<16x1xf32> to vector<16x128xf32>
    %342 = arith.subf %327, %341 : vector<16x128xf32>
    %cst_90 = arith.constant 9.99999974E-6 : f32
    %343 = vector.broadcast %cst_90 : f32 to vector<16x1xf32>
    %344 = arith.addf %340, %343 : vector<16x1xf32>
    %345 = math.rsqrt %344 : vector<16x1xf32>
    %346 = vector.broadcast %345 : vector<16x1xf32> to vector<16x128xf32>
    %347 = arith.mulf %342, %346 : vector<16x128xf32>
    %348 = vector.broadcast %328 : vector<1x128xf32> to vector<16x128xf32>
    %349 = arith.mulf %347, %348 : vector<16x128xf32>
    %350 = vector.broadcast %329 : vector<1x128xf32> to vector<16x128xf32>
    %351 = arith.addf %349, %350 : vector<16x128xf32>
    %352 = arith.truncf %351 : vector<16x128xf32> to vector<16x128xbf16>
    %c1_91 = arith.constant 1 : index
    %c0_92 = arith.constant 0 : index
    %c0_93 = arith.constant 0 : index
    %353 = vector.load %arg7[%c1_91, %c0_92, %c0_93] : memref<2x128x128xbf16, #tpu.memory_space<vmem>>, vector<1x128x128xbf16>
    %354 = vector.shape_cast %353 : vector<1x128x128xbf16> to vector<128x128xbf16>
    %cst_94 = arith.constant dense<0.000000e+00> : vector<16x128xf32>
    %355 = tpu.matmul %352, %354, %cst_94 {dimension_numbers = #tpu.dot_dimension_numbers<[1], [0], [0], [1], [0, 0, 1, 1], [], []>} : vector<16x128xbf16>, vector<128x128xbf16>, vector<16x128xf32> -> vector<16x128xf32>
    %356 = vector.extract_strided_slice %214 {offsets = [9, 0], sizes = [1, 128], strides = [1, 1]} : vector<10x128xf32> to vector<1x128xf32>
    %357 = vector.broadcast %356 : vector<1x128xf32> to vector<16x128xf32>
    %358 = arith.addf %355, %357 : vector<16x128xf32>
    %cst_95 = arith.constant 1.702000e+00 : f32
    %359 = vector.broadcast %cst_95 : f32 to vector<16x128xf32>
    %360 = arith.mulf %359, %358 : vector<16x128xf32>
    %361 = arith.negf %360 : vector<16x128xf32>
    %362 = math.exp %361 : vector<16x128xf32>
    %cst_96 = arith.constant 1.000000e+00 : f32
    %363 = vector.broadcast %cst_96 : f32 to vector<16x128xf32>
    %364 = arith.addf %363, %362 : vector<16x128xf32>
    %365 = arith.divf %363, %364 : vector<16x128xf32>
    %366 = arith.mulf %358, %365 : vector<16x128xf32>
    %367 = arith.truncf %366 : vector<16x128xf32> to vector<16x128xbf16>
    %c1_97 = arith.constant 1 : index
    %c0_98 = arith.constant 0 : index
    %c0_99 = arith.constant 0 : index
    %368 = vector.load %arg8[%c1_97, %c0_98, %c0_99] : memref<2x128x128xbf16, #tpu.memory_space<vmem>>, vector<1x128x128xbf16>
    %369 = vector.shape_cast %368 : vector<1x128x128xbf16> to vector<128x128xbf16>
    %cst_100 = arith.constant dense<0.000000e+00> : vector<16x128xf32>
    %370 = tpu.matmul %367, %369, %cst_100 {dimension_numbers = #tpu.dot_dimension_numbers<[1], [0], [0], [1], [0, 0, 1, 1], [], []>} : vector<16x128xbf16>, vector<128x128xbf16>, vector<16x128xf32> -> vector<16x128xf32>
    %371 = arith.addf %327, %370 : vector<16x128xf32>
    %372 = vector.extract_strided_slice %214 {offsets = [5, 0], sizes = [1, 128], strides = [1, 1]} : vector<10x128xf32> to vector<1x128xf32>
    %373 = vector.broadcast %372 : vector<1x128xf32> to vector<16x128xf32>
    %374 = arith.addf %371, %373 : vector<16x128xf32>
    %375 = vector.shape_cast %374 : vector<16x128xf32> to vector<2x8x128xf32>
    %376 = vector.extract_strided_slice %375 {offsets = [0, 0, 0], sizes = [2, 1, 128], strides = [1, 1, 1]} : vector<2x8x128xf32> to vector<2x1x128xf32>
    %377 = vector.shape_cast %376 : vector<2x1x128xf32> to vector<2x128xf32>
    %378 = vector.extract_strided_slice %16 {offsets = [2, 0], sizes = [1, 128], strides = [1, 1]} : vector<4x128xf32> to vector<1x128xf32>
    %379 = vector.extract_strided_slice %16 {offsets = [3, 0], sizes = [1, 128], strides = [1, 1]} : vector<4x128xf32> to vector<1x128xf32>
    %cst_101 = arith.constant dense<0.000000e+00> : vector<2xf32>
    %380 = vector.multi_reduction <add>, %377, %cst_101 [1] : vector<2x128xf32> to vector<2xf32>
    %381 = vector.shape_cast %380 : vector<2xf32> to vector<2x1xf32>
    %cst_102 = arith.constant 3.125000e-02 : f32
    %382 = vector.broadcast %cst_102 : f32 to vector<2x1xf32>
    %383 = arith.mulf %381, %382 : vector<2x1xf32>
    %384 = arith.mulf %377, %377 : vector<2x128xf32>
    %cst_103 = arith.constant dense<0.000000e+00> : vector<2xf32>
    %385 = vector.multi_reduction <add>, %384, %cst_103 [1] : vector<2x128xf32> to vector<2xf32>
    %386 = vector.shape_cast %385 : vector<2xf32> to vector<2x1xf32>
    %cst_104 = arith.constant 3.125000e-02 : f32
    %387 = vector.broadcast %cst_104 : f32 to vector<2x1xf32>
    %388 = arith.mulf %386, %387 : vector<2x1xf32>
    %389 = arith.mulf %383, %383 : vector<2x1xf32>
    %390 = arith.subf %388, %389 : vector<2x1xf32>
    %391 = vector.broadcast %383 : vector<2x1xf32> to vector<2x128xf32>
    %392 = arith.subf %377, %391 : vector<2x128xf32>
    %cst_105 = arith.constant 9.99999974E-6 : f32
    %393 = vector.broadcast %cst_105 : f32 to vector<2x1xf32>
    %394 = arith.addf %390, %393 : vector<2x1xf32>
    %395 = math.rsqrt %394 : vector<2x1xf32>
    %396 = vector.broadcast %395 : vector<2x1xf32> to vector<2x128xf32>
    %397 = arith.mulf %392, %396 : vector<2x128xf32>
    %398 = vector.broadcast %378 : vector<1x128xf32> to vector<2x128xf32>
    %399 = arith.mulf %397, %398 : vector<2x128xf32>
    %400 = vector.broadcast %379 : vector<1x128xf32> to vector<2x128xf32>
    %401 = arith.addf %399, %400 : vector<2x128xf32>
    %402 = arith.truncf %401 : vector<2x128xf32> to vector<2x128xbf16>
    %c0_106 = arith.constant 0 : index
    %c0_107 = arith.constant 0 : index
    %403 = vector.load %arg10[%c0_106, %c0_107] : memref<128x128xbf16, #tpu.memory_space<vmem>>, vector<128x128xbf16>
    %cst_108 = arith.constant dense<0.000000e+00> : vector<2x128xf32>
    %404 = tpu.matmul %402, %403, %cst_108 {dimension_numbers = #tpu.dot_dimension_numbers<[1], [0], [0], [1], [0, 0, 1, 1], [], []>} : vector<2x128xbf16>, vector<128x128xbf16>, vector<2x128xf32> -> vector<2x128xf32>
    %405 = vector.shape_cast %404 : vector<2x128xf32> to vector<2x1x128xf32>
    %c0_109 = arith.constant 0 : index
    %c0_110 = arith.constant 0 : index
    %c0_111 = arith.constant 0 : index
    %406 = vector.load %arg11[%c0_109, %c0_110, %c0_111] : memref<2x1x128xf32, #tpu.memory_space<vmem>>, vector<2x1x128xf32>
    tpu.vector_store %arg11[%c0_109, %c0_110, %c0_111], %405 {strides = array<i32>} : memref<2x1x128xf32, #tpu.memory_space<vmem>>, vector<2x1x128xf32>,
    return
  }
  func.func @transform_0(%arg0: i32) -> (i32, i32, i32) {
    %c0_i32 = arith.constant 0 : i32
    %c0_i32_0 = arith.constant 0 : i32
    %c0_i32_1 = arith.constant 0 : i32
    return %arg0, %c0_i32, %c0_i32_0 : i32, i32, i32
  }
  func.func @transform_1(%arg0: i32) -> (i32, i32) {
    %c0_i32 = arith.constant 0 : i32
    %c0_i32_0 = arith.constant 0 : i32
    %c0_i32_1 = arith.constant 0 : i32
    return %c0_i32, %c0_i32_0 : i32, i32
  }
  func.func @transform_2(%arg0: i32) -> (i32, i32) {
    %c0_i32 = arith.constant 0 : i32
    %c0_i32_0 = arith.constant 0 : i32
    %c0_i32_1 = arith.constant 0 : i32
    return %c0_i32, %c0_i32_0 : i32, i32
  }
  func.func @transform_3(%arg0: i32) -> (i32, i32) {
    %c0_i32 = arith.constant 0 : i32
    %c0_i32_0 = arith.constant 0 : i32
    %c0_i32_1 = arith.constant 0 : i32
    return %c0_i32, %c0_i32_0 : i32, i32
  }
  func.func @transform_4(%arg0: i32) -> (i32, i32, i32) {
    %c0_i32 = arith.constant 0 : i32
    %c0_i32_0 = arith.constant 0 : i32
    %c0_i32_1 = arith.constant 0 : i32
    %c0_i32_2 = arith.constant 0 : i32
    return %c0_i32, %c0_i32_0, %c0_i32_1 : i32, i32, i32
  }
  func.func @transform_5(%arg0: i32) -> (i32, i32, i32) {
    %c0_i32 = arith.constant 0 : i32
    %c0_i32_0 = arith.constant 0 : i32
    %c0_i32_1 = arith.constant 0 : i32
    %c0_i32_2 = arith.constant 0 : i32
    return %c0_i32, %c0_i32_0, %c0_i32_1 : i32, i32, i32
  }
  func.func @transform_6(%arg0: i32) -> (i32, i32, i32) {
    %c0_i32 = arith.constant 0 : i32
    %c0_i32_0 = arith.constant 0 : i32
    %c0_i32_1 = arith.constant 0 : i32
    %c0_i32_2 = arith.constant 0 : i32
    return %c0_i32, %c0_i32_0, %c0_i32_1 : i32, i32, i32
  }
  func.func @transform_7(%arg0: i32) -> (i32, i32, i32) {
    %c0_i32 = arith.constant 0 : i32
    %c0_i32_0 = arith.constant 0 : i32
    %c0_i32_1 = arith.constant 0 : i32
    %c0_i32_2 = arith.constant 0 : i32
    return %c0_i32, %c0_i32_0, %c0_i32_1 : i32, i32, i32
  }
  func.func @transform_8(%arg0: i32) -> (i32, i32, i32) {
    %c0_i32 = arith.constant 0 : i32
    %c0_i32_0 = arith.constant 0 : i32
    %c0_i32_1 = arith.constant 0 : i32
    %c0_i32_2 = arith.constant 0 : i32
    return %c0_i32, %c0_i32_0, %c0_i32_1 : i32, i32, i32
  }
  func.func @transform_9(%arg0: i32) -> (i32, i32) {
    %c0_i32 = arith.constant 0 : i32
    %c0_i32_0 = arith.constant 0 : i32
    %c0_i32_1 = arith.constant 0 : i32
    return %c0_i32, %c0_i32_0 : i32, i32
  }
  func.func @transform_10(%arg0: i32) -> (i32, i32, i32) {
    %c0_i32 = arith.constant 0 : i32
    %c0_i32_0 = arith.constant 0 : i32
    %c0_i32_1 = arith.constant 0 : i32
    return %arg0, %c0_i32, %c0_i32_0 : i32, i32, i32
  }
}

</mosaic_0001>

<bundles_post_ra>
// kernel: split.12
= control target key start
LH: loop header
LB: loop body
LE: loop exit
PB: predicated region body
PF: predicated region fallthrough
CT: control target
= control target key end

     0   :  { %s65_s0 = inlined_call_operand.vmem [shape: f32[32,96], index: 0, kind: input, shape index: {}]   ;;  %s66_s1 = inlined_call_operand.vmem [shape: bf16[32,32], index: 1, kind: output, shape index: {}]  }
   0x1   :  { %v2_v0 = vld [vmem:[%s65_s0] sm:$0xff]  ;;  %v20_v1 = vld [vmem:[%s65_s0 + $0x8] sm:$0xff]  ;;  %v22_v2 = vld [vmem:[%s65_s0 + $0x10] sm:$0xff] }
   0x2   :  { %v29_v3 = vpack.c.bf16 %v20_v1, %v2_v0  ;;  %v24_v4 = vld [vmem:[%s65_s0 + $0x18] sm:$0xff] }
   0x3   :  { %v34_v5 = vpack.c.bf16 %v24_v4, %v22_v2 }
   0x4   :  { %30 = vst [vmem:[%s66_s1] sm:$0xff] %v29_v3  }
   0x5   :  { %36 = vst [vmem:[%s66_s1 + $0x8] sm:$0xff] %v34_v5  }

// kernel: clip_encode_image.1
= control target key start
LH: loop header
LB: loop body
LE: loop exit
PB: predicated region body
PF: predicated region fallthrough
CT: control target
= control target key end

     0   :  { %s4382_s0 = inlined_call_operand.vmem [shape: bf16[2,8,256], index: 0, kind: input, shape index: {}]   ;;  %s4383_s1 = inlined_call_operand.vmem [shape: bf16[256,128], index: 1, kind: input, shape index: {}]   ;;  %s4384_s2 = inlined_call_operand.vmem [shape: f32[8,128], index: 2, kind: input, shape index: {}]   ;;  %s4385_s3 = inlined_call_operand.vmem [shape: f32[4,128], index: 3, kind: input, shape index: {}]   ;;  %s4386_s4 = inlined_call_operand.vmem [shape: bf16[2,128,384], index: 4, kind: input, shape index: {}]   ;;  %s4387_s5 = inlined_call_operand.vmem [shape: bf16[2,128,128], index: 5, kind: input, shape index: {}]   ;;  %s4388_s6 = inlined_call_operand.vmem [shape: bf16[2,128,128], index: 6, kind: input, shape index: {}]   ;;  %s4389_s7 = inlined_call_operand.vmem [shape: bf16[2,128,128], index: 7, kind: input, shape index: {}]   ;;  %s4390_s8 = inlined_call_operand.vmem [shape: f32[2,10,128], index: 8, kind: input, shape index: {}]   ;;  %s4391_s9 = inlined_call_operand.vmem [shape: bf16[128,128], index: 9, kind: input, shape index: {}]   ;;  %s4392_s10 = inlined_call_operand.hbm [shape: f32[2,1,128], index: 10, kind: output, shape index: {}]  }
   0x1   :  { %v3245_v0 = vld [vmem:[%s4383_s1 + $0x40] sm:$0xff]   ;;  %v3247_v2 = vld [vmem:[%s4383_s1 + $0x48] sm:$0xff]   ;;  %v3249_v4 = vld [vmem:[%s4383_s1 + $0x50] sm:$0xff]  }
   0x2   :  { %v3246_v1 = vld [vmem:[%s4383_s1] sm:$0xff]   ;;  %2879 = vmatprep.subr.bf16.mxu0 %v3245_v0  ;;  %v3248_v3 = vld [vmem:[%s4383_s1 + $0x8] sm:$0xff]   ;;  %v3250_v5 = vld [vmem:[%s4383_s1 + $0x10] sm:$0xff]  }
   0x3   :  { %2880 = vmatpush3.bf16.msra.mxu0 %v3246_v1  ;;  %v3251_v6 = vld [vmem:[%s4383_s1 + $0x58] sm:$0xff]   ;;  %v3253_v8 = vld [vmem:[%s4383_s1 + $0x60] sm:$0xff]   ;;  %v3255_v10 = vld [vmem:[%s4383_s1 + $0x68] sm:$0xff]  }
   0x4   :  { %2881 = vmatprep.subr.bf16.mxu0 %v3247_v2  ;;  %v3252_v7 = vld [vmem:[%s4383_s1 + $0x18] sm:$0xff]   ;;  %v3254_v9 = vld [vmem:[%s4383_s1 + $0x20] sm:$0xff]   ;;  %v3256_v11 = vld [vmem:[%s4383_s1 + $0x28] sm:$0xff]  }
   0x5   :  { %v3263_v12 = vld [vmem:[%s4382_s0 + $0x4] ss:$8 sps:$4 sm:$0xff]   ;;  %v3257_v13 = vld [vmem:[%s4383_s1 + $0x70] sm:$0xff]   ;;  %v3259_v15 = vld [vmem:[%s4383_s1 + $0x78] sm:$0xff]  }
   0x6   :  { %234 = vmatprep.mubr.bf16.mxu0 %v3263_v12  ;;  %v3258_v14 = vld [vmem:[%s4383_s1 + $0x30] sm:$0xff]   ;;  %v3260_v16 = vld [vmem:[%s4383_s1 + $0x38] sm:$0xff]   ;;  %v3261_v17 = vld [vmem:[%s4382_s0] ss:$8 sps:$4 sm:$0xff]  }
   0x7   :  { %2882 = vmatpush3.bf16.msra.mxu0 %v3248_v3 }
   0x8   :  { %2883 = vmatprep.subr.bf16.mxu0 %v3249_v4 }
   0xb   :  { %2884 = vmatpush3.bf16.msra.mxu0 %v3250_v5 }
   0xc   :  { %2885 = vmatprep.subr.bf16.mxu0 %v3251_v6 }
   0xf   :  { %2886 = vmatpush3.bf16.msra.mxu0 %v3252_v7 }
  0x10   :  { %2887 = vmatprep.subr.bf16.mxu0 %v3253_v8 }
  0x13   :  { %2888 = vmatpush3.bf16.msra.mxu0 %v3254_v9 }
  0x14   :  { %2889 = vmatprep.subr.bf16.mxu0 %v3255_v10 }
  0x17   :  { %2890 = vmatpush3.bf16.msra.mxu0 %v3256_v11 }
  0x18   :  { %2891 = vmatprep.subr.bf16.mxu0 %v3257_v13 }
  0x1b   :  { %2892 = vmatpush3.bf16.msra.mxu0 %v3258_v14 }
  0x1c   :  { %2893 = vmatprep.subr.bf16.mxu0 %v3259_v15 }
  0x1f   :  { %2894 = vmatpush3.bf16.msra.mxu0 %v3260_v16 }
  0x22   :  { %235 = vmatmul.mubr.bf16.vlgmr.msra.gmra.mrb[0].mxu0 %v3261_v17 }
  0x23   :  { %15 = vsyncpa [#allocation3], 0  ;;  %v95_v19 = vld [vmem:[%s4384_s2] sm:$0xff]  ;;  %v37_v38 = vlaneseq  ;;  %v3267_v0 = vld [vmem:[%s4386_s4 + $0x8] ss:$12 sps:$4 sm:$0xff]   ;;  %v3511_v1 = vmov 0.0  }
  0x24   :  { %v60_v46 = vld [vmem:[%s4385_s3] sm:$0xf]  ;;  %v3264_v62 = vld [vmem:[%s4386_s4 + $0x4] ss:$12 sps:$4 sm:$0xff]   ;;  %3006 = vmatprep.subr.bf16.mxu0 %v3511_v1  ;;  %v3268_v2 = vld [vmem:[%s4386_s4 + $0x1c] ss:$12 sps:$4 sm:$0xff]  }
  0x25   :  { %v3631_v43 = vshrl.u32 %v37_v38, 7  ;;  %v3266_v63 = vld [vmem:[%s4386_s4] ss:$12 sps:$4 sm:$0xff]   ;;  %482 = vmatprep.subr.bf16.mxu1 %v3264_v62  ;;  %3007 = vmatpush3.bf16.msra.mxu0 %v3267_v0  ;;  %v3270_v3 = vld [vmem:[%s4386_s4 + $0x18] ss:$12 sps:$4 sm:$0xff]   ;;  %vm3513_vm0 = vmmov 0  }
  0x26   :  { %483 = vmatpush1.bf16.msra.mxu1 %v3266_v63  ;;  %3008 = vmatprep.subr.bf16.mxu0 %v3511_v1  ;;  %v3271_v4 = vld [vmem:[%s4386_s4 + $0x20] ss:$12 sps:$4 sm:$0xff]   ;;  %v3274_v6 = vld [vmem:[%s4386_s4 + $0x30] ss:$12 sps:$4 sm:$0xff]   ;;  %v3275_v7 = vld [vmem:[%s4386_s4 + $0x38] ss:$12 sps:$4 sm:$0xff]  }
  0x27   :  { %v3634_v45 = vsub.s32 0, %v3631_v43  ;;  %v3640_v47 = vsub.s32 1, %v3631_v43  ;;  %484 = vmatprep.subr.bf16.mxu1 %v3268_v2  ;;  %v3272_v5 = vld [vmem:[%s4386_s4 + $0x34] ss:$12 sps:$4 sm:$0xff]   ;;  %v3276_v8 = vld [vmem:[%s4386_s4 + $0x4c] ss:$12 sps:$4 sm:$0xff]   ;;  %3022 = vmatprep.mubr.msk.bf16.mxu0 %vm3513_vm0, %v3511_v1 }
  0x28   :  { %v3278_v9 = vld [vmem:[%s4386_s4 + $0x48] ss:$12 sps:$4 sm:$0xff]   ;;  %v3279_v10 = vld [vmem:[%s4386_s4 + $0x50] ss:$12 sps:$4 sm:$0xff]   ;;  %v3282_v12 = vld [vmem:[%s4386_s4 + $0x60] ss:$12 sps:$4 sm:$0xff]  }
  0x29   :  { %v272_v49 = vrot.slane %v60_v46, %v3634_v45  ;;  %v278_v52 = vrot.slane %v60_v46, %v3640_v47  ;;  %3009 = vmatpush3.bf16.msra.mxu0 %v3271_v4  ;;  %v3280_v11 = vld [vmem:[%s4386_s4 + $0x64] ss:$12 sps:$4 sm:$0xff]   ;;  %v3283_v13 = vld [vmem:[%s4386_s4 + $0x68] ss:$12 sps:$4 sm:$0xff]   ;;  %v3287_v16 = vld [vmem:[%s4386_s4 + $0x80] ss:$12 sps:$4 sm:$0xff]  }
  0x2a   :  { %485 = vmatpush1.bf16.msra.mxu1 %v3270_v3  ;;  %3010 = vmatprep.subr.bf16.mxu0 %v3511_v1  ;;  %v3284_v14 = vld [vmem:[%s4386_s4 + $0x7c] ss:$12 sps:$4 sm:$0xff]   ;;  %v3286_v15 = vld [vmem:[%s4386_s4 + $0x78] ss:$12 sps:$4 sm:$0xff]   ;;  %v3288_v17 = vld [vmem:[%s4386_s4 + $0x94] ss:$12 sps:$4 sm:$0xff]  }
  0x2b   :  { %486 = vmatprep.subr.bf16.mxu1 %v3272_v5  ;;  %vm716_vm11 = vcmask 1043456   ;;  %vm663_vm13 = vcmask 64512   ;;  %vm2437_vm14 = vcmask 1041409   ;;  %vm2440_vm15 = vcmask 1041408  }
  0x2d   :  { %3011 = vmatpush3.bf16.msra.mxu0 %v3275_v7 }
  0x2e   :  { %487 = vmatpush1.bf16.msra.mxu1 %v3274_v6  ;;  %3012 = vmatprep.subr.bf16.mxu0 %v3511_v1 }
  0x2f   :  { %488 = vmatprep.subr.bf16.mxu1 %v3276_v8 }
  0x31   :  { %3013 = vmatpush3.bf16.msra.mxu0 %v3279_v10 }
  0x32   :  { %489 = vmatpush1.bf16.msra.mxu1 %v3278_v9  ;;  %3014 = vmatprep.subr.bf16.mxu0 %v3511_v1 }
  0x33   :  { %490 = vmatprep.subr.bf16.mxu1 %v3280_v11 }
  0x35   :  { %3015 = vmatpush3.bf16.msra.mxu0 %v3283_v13 }
  0x36   :  { %491 = vmatpush1.bf16.msra.mxu1 %v3282_v12  ;;  %3016 = vmatprep.subr.bf16.mxu0 %v3511_v1 }
  0x37   :  { %492 = vmatprep.subr.bf16.mxu1 %v3284_v14 }
  0x39   :  { %3017 = vmatpush3.bf16.msra.mxu0 %v3287_v16 }
  0x3a   :  { %493 = vmatpush1.bf16.msra.mxu1 %v3286_v15  ;;  %3018 = vmatprep.subr.bf16.mxu0 %v3511_v1 }
  0x3b   :  { %494 = vmatprep.subr.bf16.mxu1 %v3288_v17 }
  0xf5   :  { %v2895_v18 = vpop.f32.mrb[0].mxu0 }
  0xf6   :  { %v2896_v20 = vpop.f32.mrb[1].mxu0 }
  0xf7   :  { %v2897_v21 = vadd.f32 %v2896_v20, %v2895_v18  ;;  %v2898_v22 = vpop.f32.mrb[2].mxu0  ;;  %v3512_v18 = vmov 0   ;;  %v3291_v20 = vld [vmem:[%s4386_s4 + $0x98] ss:$12 sps:$4 sm:$0xff]  }
  0xf8   :  { %v2899_v23 = vpop.f32.mrb[3].mxu0  ;;  %514 = vmatprep.mubr.bf16.mxu1 %v3512_v18  ;;  %3019 = vmatpush3.bf16.msra.mxu0 %v3291_v20 }
  0xf9   :  { %v237_v24 = vadd.f32 %v2897_v21, %v95_v19  ;;  %v2900_v25 = vadd.f32 %v2899_v23, %v2898_v22  ;;  %v3292_v21 = vld [vmem:[%s4386_s4 + $0xac] ss:$12 sps:$4 sm:$0xff]   ;;  %v3294_v22 = vld [vmem:[%s4386_s4 + $0xa8] ss:$12 sps:$4 sm:$0xff]   ;;  %v3295_v23 = vld [vmem:[%s4386_s4 + $0xb0] ss:$12 sps:$4 sm:$0xff]   ;;  %3020 = vmatprep.subr.bf16.mxu0 %v3511_v1 }
  0xfb   :  { %v240_v26 = vadd.f32 %v2900_v25, %v95_v19  ;;  %243 = vadd.xlane.f32.xlu0 %v237_v24  ;;  %v249_v27 = vmul.f32 %v237_v24, %v237_v24  ;;  %v3290_v19 = vld [vmem:[%s4386_s4 + $0x90] ss:$12 sps:$4 sm:$0xff]  }
  0xfc   :  { %495 = vmatpush1.bf16.msra.mxu1 %v3290_v19  ;;  %3021 = vmatpush3.bf16.msra.mxu0 %v3295_v23 }
  0xfd   :  { %251 = vadd.xlane.f32.xlu1 %v249_v27  ;;  %v250_v28 = vmul.f32 %v240_v26, %v240_v26  ;;  %496 = vmatprep.subr.bf16.mxu1 %v3292_v21 }
  0xfe   :  { %3050 = vmatprep.subr.bf16.mxu0 %v3511_v1 }
  0xff   :  { %245 = vadd.xlane.f32.xlu0 %v240_v26 }
 0x100   :  { %497 = vmatpush1.bf16.msra.mxu1 %v3294_v22 }
 0x101   :  { %253 = vadd.xlane.f32.xlu1 %v250_v28 }
 0x188   :  { %v244_v29 = vpop.xlane.xlu0 %243 }
 0x189   :  { %v247_v30 = vmul.f32 0.03125, %v244_v29 }
 0x18a   :  { %v252_v31 = vpop.xlane.xlu1 %251 }
 0x18b   :  { %v257_v32 = vmul.f32 %v247_v30, %v247_v30  ;;  %v255_v33 = vmul.f32 0.03125, %v252_v31  ;;  %v261_v48 = vsub.f32 %v237_v24, %v247_v30 }
 0x18c   :  { %v246_v34 = vpop.xlane.xlu0 %245 }
 0x18d   :  { %v259_v35 = vsub.f32 %v255_v33, %v257_v32  ;;  %v248_v36 = vmul.f32 0.03125, %v246_v34 }
 0x18e   :  { %v254_v37 = vpop.xlane.xlu1 %253 }
 0x18f   :  { %v263_v39 = vadd.f32 1e-05, %v259_v35  ;;  %v258_v40 = vmul.f32 %v248_v36, %v248_v36  ;;  %v256_v41 = vmul.f32 0.03125, %v254_v37  ;;  %v262_v53 = vsub.f32 %v240_v26, %v248_v36 }
 0x191   :  { %3384 = vrsqrt.f32 %v263_v39  ;;  %v260_v42 = vsub.f32 %v256_v41, %v258_v40  ;;  %v3741_v39 = vld [vmem:[%s4390_s8] sm:$0xff] }
 0x193   :  { %v264_v44 = vadd.f32 1e-05, %v260_v42 }
 0x195   :  { %3386 = vrsqrt.f32 %v264_v44  ;;  %v312_v44 = vrot.slane %v3741_v39, %v3634_v45 }
 0x19b   :  { %v3385_v50 = vpop.eup %3384 }
 0x19c   :  { %v267_v51 = vmul.f32 %v3385_v50, %v261_v48 }
 0x19e   :  { %v273_v54 = vmul.f32 %v272_v49, %v267_v51  ;;  %v318_v51 = vrot.slane %v3741_v39, %v3640_v47 }
 0x19f   :  { %v3387_v55 = vpop.eup %3386 }
 0x1a0   :  { %v3644_v56 = vadd.f32 %v278_v52, %v273_v54  ;;  %v268_v57 = vmul.f32 %v3387_v55, %v262_v53 }
 0x1a2   :  { %283 = vadd.xlane.f32.xlu0 %v3644_v56  ;;  %v274_v58 = vmul.f32 %v272_v49, %v268_v57  ;;  %v289_v60 = vmul.f32 %v3644_v56, %v3644_v56  ;;  %v3752_v57 = vand.u32 127, %v37_v38 }
 0x1a4   :  { %v3647_v59 = vadd.f32 %v278_v52, %v274_v58  ;;  %v568_v58 = vsub.s32 6, %v3631_v43  ;;  %vm40_vm1 = vcmp.ge.s32.totalorder %v3752_v57, 8  ;;  %vm44_vm2 = vcmp.lt.s32.totalorder %v3752_v57, 16 }
 0x1a5   :  { %vm43_vm3 = vcmp.lt.s32.totalorder %v3752_v57, 8  ;;  %vm48_vm4 = vmand %vm40_vm1, %vm44_vm2  ;;  %vm41_vm5 = vcmp.ge.s32.totalorder %v3752_v57, 16  ;;  %vm45_vm6 = vcmp.lt.s32.totalorder %v3752_v57, 24  ;;  %vm42_vm7 = vcmp.ge.s32.totalorder %v3752_v57, 24 }
 0x1a6   :  { %285 = vadd.xlane.f32.xlu1 %v3647_v59  ;;  %291 = vadd.xlane.f32.xlu0 %v289_v60  ;;  %v290_v61 = vmul.f32 %v3647_v59, %v3647_v59  ;;  %v3758_v60 = vld [vmem:[%s4390_s8 + $0x8] sm:$0x3]  ;;  %v569_v62 = vrot.slane %v3741_v39, %v568_v58  ;;  %vm46_vm8 = vcmp.lt.s32.totalorder %v3752_v57, 32  ;;  %v3777_v8 = vsel %vm43_vm3, 1.0, %v3511_v1  ;;  %vm49_vm9 = vmand %vm41_vm5, %vm45_vm6 }
 0x1a7   :  { %v584_v38 = vrot.slane %v3758_v60, %v3634_v45  ;;  %v3780_v9 = vsel %vm48_vm4, 1.0, %v3511_v1  ;;  %vm50_vm10 = vmand %vm42_vm7, %vm46_vm8  ;;  %v3795_v23 = vsel %vm49_vm9, 1.0, %v3511_v1  ;;  %vm59_vm12 = vcmp.lt.s32.totalorder %v3752_v57, 5 }
 0x1aa   :  { %293 = vadd.xlane.f32.xlu1 %v290_v61  ;;  %v576_v61 = vsub.s32 7, %v3631_v43 }
 0x1ac   :  { %v577_v2 = vrot.slane %v3741_v39, %v576_v61 }
 0x22f   :  { %v284_v24 = vpop.xlane.xlu0 %283 }
 0x230   :  { %v287_v25 = vmul.f32 0.03125, %v284_v24  ;;  %v3798_v24 = vsel %vm50_vm10, 1.0, %v3511_v1 }
 0x232   :  { %v297_v28 = vmul.f32 %v287_v25, %v287_v25  ;;  %v301_v40 = vsub.f32 %v3644_v56, %v287_v25 }
 0x233   :  { %v286_v26 = vpop.xlane.xlu1 %285  ;;  %v292_v27 = vpop.xlane.xlu0 %291 }
 0x234   :  { %v288_v29 = vmul.f32 0.03125, %v286_v26  ;;  %v295_v30 = vmul.f32 0.03125, %v292_v27 }
 0x236   :  { %v299_v31 = vsub.f32 %v295_v30, %v297_v28  ;;  %v298_v33 = vmul.f32 %v288_v29, %v288_v29  ;;  %v302_v46 = vsub.f32 %v3647_v59, %v288_v29 }
 0x237   :  { %v294_v32 = vpop.xlane.xlu1 %293 }
 0x238   :  { %v303_v34 = vadd.f32 1e-05, %v299_v31  ;;  %v296_v35 = vmul.f32 0.03125, %v294_v32 }
 0x23a   :  { %3388 = vrsqrt.f32 %v303_v34  ;;  %v300_v36 = vsub.f32 %v296_v35, %v298_v33 }
 0x23c   :  { %v304_v37 = vadd.f32 1e-05, %v300_v36 }
 0x23e   :  { %3390 = vrsqrt.f32 %v304_v37 }
 0x244   :  { %v3389_v41 = vpop.eup %3388 }
 0x245   :  { %v307_v42 = vmul.f32 %v3389_v41, %v301_v40 }
 0x247   :  { %v313_v50 = vmul.f32 %v312_v44, %v307_v42 }
 0x248   :  { %v3391_v48 = vpop.eup %3390 }
 0x249   :  { %v308_v49 = vmul.f32 %v3391_v48, %v302_v46  ;;  %v319_v53 = vadd.f32 %v318_v51, %v313_v50 }
 0x24b   :  { %v314_v52 = vmul.f32 %v312_v44, %v308_v49 }
 0x24d   :  { %v320_v54 = vadd.f32 %v318_v51, %v314_v52 }
 0x24f   :  { %v321_v55 = vpack.c.bf16 %v320_v54, %v319_v53 }
 0x251   :  { %515 = vmatmul.mubr.bf16.vlgmr.msra.gmra.mrb[0].mxu1 %v321_v55  ;;  %3023 = vmatmul.mubr.bf16.vlgmr.msra.gmra.mrb[4].mxu0 %v321_v55 }
 0x252   :  { %3066 = vmatprep.mubr.msk.bf16.mxu0 %vm3513_vm0, %v3511_v1 }
 0x324   :  { %v516_v63 = vpop.f32.mrb[0].mxu1  ;;  %v559_v0 = vpop.f32.mrb[4].mxu0 }
 0x325   :  { %v570_v3 = vadd.f32 %v569_v62, %v516_v63  ;;  %v518_v4 = vpop.f32.mrb[1].mxu1  ;;  %v3024_v5 = vpop.f32.mrb[5].mxu0  ;;  %v585_v11 = vadd.f32 %v584_v38, %v559_v0 }
 0x326   :  { %v520_v6 = vpop.f32.mrb[2].mxu1  ;;  %v562_v7 = vpop.f32.mrb[6].mxu0  ;;  %v578_v16 = vadd.f32 %v577_v2, %v518_v4 }
 0x327   :  { %v572_v10 = vmul.f32 0.35355338, %v570_v3  ;;  %v3782_v12 = vadd.f32 %v569_v62, %v520_v6  ;;  %v586_v13 = vadd.f32 %v584_v38, %v562_v7  ;;  %v522_v14 = vpop.f32.mrb[3].mxu1  ;;  %v3025_v15 = vpop.f32.mrb[7].mxu0 }
 0x328   :  { %v579_v17 = vadd.f32 %v577_v2, %v522_v14 }
 0x329   :  { %v3788_v19 = vpack.c.bf16 %v586_v13, %v585_v11  ;;  %v588_v21 = vmul.f32 %v3777_v8, %v572_v10  ;;  %v589_v22 = vmul.f32 %v3780_v9, %v572_v10  ;;  %v590_v26 = vmul.f32 %v3795_v23, %v572_v10 }
 0x32a   :  { %v3790_v20 = vpack.c.bf16 %v579_v17, %v578_v16  ;;  %v591_v27 = vmul.f32 %v3798_v24, %v572_v10 }
 0x32b   :  { %v2871_v25 = vpack.c.bf16 %v589_v22, %v588_v21  ;;  %v718_v29 = vsel %vm716_vm11, %v3788_v19, 0  ;;  %v573_v22 = vmul.f32 0.35355338, %v3782_v12 }
 0x32c   :  { %3026 = vmatprep.subr.bf16.mxu1 %v3790_v20  ;;  %v2872_v28 = vpack.c.bf16 %v591_v27, %v590_v26  ;;  %v797_v30 = vrot.slane %v3790_v20, 4 }
 0x32d   :  { %3027 = vmatpush3.bf16.xpose.msra.mxu1 %v3790_v20  ;;  %3028 = vmatprep.mubr.bf16.mxu1 %v2871_v25  ;;  %v778_v12 = vmul.f32 %v3795_v23, %v573_v22 }
 0x32e   :  { %3234 = vmatprep.subr.msk.bf16.mxu1 %vm716_vm11, %v3788_v19 }
 0x334   :  { %3029 = vmatmul.mubr.bf16.vlgmr.msra.gmra.mrb[4].mxu1 %v2872_v28 }
 0x335   :  { %3033 = vmatpush3.bf16.msra.mxu1 %v718_v29 }
 0x336   :  { %3038 = vmatprep.subr.bf16.mxu1 %v797_v30 }
 0x407   :  { %v3030_v31 = vpop.f32.mrb[4].mxu1 }
 0x408   :  { %v642_v32 = vpop.f32.mrb[5].mxu1  ;;  %v661_v37 = vsel %vm59_vm12, %v3030_v31, -1e+30  ;;  %v776_v31 = vmul.f32 %v3777_v8, %v573_v22 }
 0x409   :  { %v659_v33 = vsel %vm59_vm12, %v642_v32, -1e+30  ;;  %v3031_v34 = vpop.f32.mrb[6].mxu1  ;;  %v670_v44 = vsel %vm663_vm13, %v661_v37, -inf  ;;  %v777_v32 = vmul.f32 %v3780_v9, %v573_v22 }
 0x40a   :  { %v645_v35 = vpop.f32.mrb[7].mxu1  ;;  %v664_v36 = vsel %vm663_vm13, %v659_v33, -inf  ;;  %v662_v42 = vsel %vm59_vm12, %v3031_v34, -1e+30 }
 0x40b   :  { %v660_v40 = vsel %vm59_vm12, %v645_v35, -1e+30  ;;  %665 = vmax.xlane.f32.xlu0 %v664_v36  ;;  %v673_v46 = vsel %vm663_vm13, %v662_v42, -inf  ;;  %v2873_v36 = vpack.c.bf16 %v777_v32, %v776_v31 }
 0x40c   :  { %v667_v41 = vsel %vm663_vm13, %v660_v40, -inf }
 0x40d   :  { %668 = vmax.xlane.f32.xlu1 %v667_v41 }
 0x40f   :  { %671 = vmax.xlane.f32.xlu0 %v670_v44 }
 0x411   :  { %674 = vmax.xlane.f32.xlu1 %v673_v46 }
 0x498   :  { %v666_v48 = vpop.xlane.xlu0 %665 }
 0x499   :  { %v676_v49 = vsub.f32 %v659_v33, %v666_v48 }
 0x49a   :  { %v669_v50 = vpop.xlane.xlu1 %668 }
 0x49b   :  { %v680_v51 = vmul.f32 1.442695, %v676_v49  ;;  %v677_v52 = vsub.f32 %v660_v40, %v669_v50  ;;  %v779_v40 = vmul.f32 %v3798_v24, %v573_v22 }
 0x49c   :  { %v672_v53 = vpop.xlane.xlu0 %671 }
 0x49d   :  { %3392 = vpow2.f32 %v680_v51  ;;  %v682_v54 = vmul.f32 1.442695, %v677_v52  ;;  %v678_v55 = vsub.f32 %v661_v37, %v672_v53  ;;  %v899_v37 = vrot.slane %v3788_v19, 4 }
 0x49e   :  { %v675_v62 = vpop.xlane.xlu1 %674  ;;  %v2874_v41 = vpack.c.bf16 %v779_v40, %v778_v12  ;;  %v3297_v12 = vld [vmem:[%s4387_s5 + $0x8] sm:$0xff]   ;;  %v3298_v40 = vld [vmem:[%s4387_s5 + $0x10] sm:$0xff]  }
 0x49f   :  { %3394 = vpow2.f32 %v682_v54  ;;  %v684_v38 = vmul.f32 1.442695, %v678_v55  ;;  %v679_v63 = vsub.f32 %v662_v42, %v675_v62  ;;  %v907_v42 = vsel %vm716_vm11, %v899_v37, 0 }
 0x4a1   :  { %3396 = vpow2.f32 %v684_v38  ;;  %v686_v0 = vmul.f32 1.442695, %v679_v63 }
 0x4a3   :  { %3398 = vpow2.f32 %v686_v0 }
 0x4a7   :  { %v3393_v2 = vpop.eup %3392 }
 0x4a8   :  { %v688_v3 = vsel %vm663_vm13, %v3393_v2, 0.0 }
 0x4a9   :  { %v3395_v4 = vpop.eup %3394  ;;  %689 = vadd.xlane.f32.xlu0 %v688_v3 }
 0x4aa   :  { %v691_v5 = vsel %vm663_vm13, %v3395_v4, 0.0 }
 0x4ab   :  { %v3397_v6 = vpop.eup %3396  ;;  %692 = vadd.xlane.f32.xlu1 %v691_v5 }
 0x4ac   :  { %v694_v7 = vsel %vm663_vm13, %v3397_v6, 0.0 }
 0x4ad   :  { %v3399_v10 = vpop.eup %3398  ;;  %695 = vadd.xlane.f32.xlu0 %v694_v7 }
 0x4ae   :  { %v697_v11 = vsel %vm663_vm13, %v3399_v10, 0.0 }
 0x4af   :  { %698 = vadd.xlane.f32.xlu1 %v697_v11 }
 0x536   :  { %v690_v13 = vpop.xlane.xlu0 %689 }
 0x537   :  { %3400 = vrcp.f32 %v690_v13 }
 0x538   :  { %v693_v14 = vpop.xlane.xlu1 %692 }
 0x539   :  { %3402 = vrcp.f32 %v693_v14 }
 0x53a   :  { %v696_v15 = vpop.xlane.xlu0 %695 }
 0x53b   :  { %3404 = vrcp.f32 %v696_v15 }
 0x53c   :  { %v699_v16 = vpop.xlane.xlu1 %698 }
 0x53d   :  { %3406 = vrcp.f32 %v699_v16 }
 0x541   :  { %v3401_v17 = vpop.eup %3400 }
 0x542   :  { %v704_v25 = vmul.f32 %v3401_v17, %v3393_v2 }
 0x543   :  { %v3403_v21 = vpop.eup %3402 }
 0x544   :  { %v705_v26 = vmul.f32 %v3403_v21, %v3395_v4 }
 0x545   :  { %v3405_v27 = vpop.eup %3404 }
 0x546   :  { %v708_v28 = vpack.c.bf16 %v705_v26, %v704_v25  ;;  %v706_v33 = vmul.f32 %v3405_v27, %v3397_v6 }
 0x547   :  { %v3407_v29 = vpop.eup %3406 }
 0x548   :  { %v707_v34 = vmul.f32 %v3407_v29, %v3399_v10  ;;  %3034 = vmatprep.mubr.msk.bf16.mxu1 %vm663_vm13, %v708_v28 }
 0x54a   :  { %v709_v35 = vpack.c.bf16 %v707_v34, %v706_v33 }
 0x54c   :  { %3035 = vmatmul.mubr.msk.bf16.vlgmr.msra.gmra.mrb[8].mxu1 %vm663_vm13, %v709_v35 }
 0x54d   :  { %3039 = vmatpush3.bf16.xpose.msra.mxu1 %v797_v30  ;;  %3040 = vmatprep.mubr.bf16.mxu1 %v2873_v36 }
 0x54e   :  { %3235 = vmatprep.subr.msk.bf16.mxu1 %vm716_vm11, %v899_v37  ;;  %v3296_v37 = vld [vmem:[%s4387_s5] sm:$0xff]  }
 0x54f   :  { %3051 = vmatpush3.bf16.msra.mxu0 %v3296_v37  ;;  %v3308_v37 = vld [vmem:[%s4388_s6 + $0x20] sm:$0xff]  }
 0x550   :  { %3052 = vmatprep.subr.bf16.mxu0 %v3511_v1 }
 0x553   :  { %3053 = vmatpush3.bf16.msra.mxu0 %v3297_v12  ;;  %v3309_v12 = vld [vmem:[%s4388_s6 + $0x28] sm:$0xff]  }
 0x554   :  { %3041 = vmatmul.mubr.bf16.vlgmr.msra.gmra.mrb[12].mxu1 %v2874_v41  ;;  %3054 = vmatprep.subr.bf16.mxu0 %v3511_v1  ;;  %v3299_v41 = vld [vmem:[%s4387_s5 + $0x18] sm:$0xff]  }
 0x555   :  { %3045 = vmatpush3.bf16.msra.mxu1 %v907_v42  ;;  %v3300_v42 = vld [vmem:[%s4387_s5 + $0x20] sm:$0xff]  }
 0x556   :  { %3070 = vmatprep.subr.bf16.mxu1 %v3511_v1 }
 0x557   :  { %3055 = vmatpush3.bf16.msra.mxu0 %v3298_v40  ;;  %v3310_v40 = vld [vmem:[%s4388_s6 + $0x30] sm:$0xff]  }
 0x558   :  { %3056 = vmatprep.subr.bf16.mxu0 %v3511_v1 }
 0x55b   :  { %3057 = vmatpush3.bf16.msra.mxu0 %v3299_v41  ;;  %v3311_v41 = vld [vmem:[%s4388_s6 + $0x38] sm:$0xff]  }
 0x55c   :  { %3058 = vmatprep.subr.bf16.mxu0 %v3511_v1 }
 0x55f   :  { %3059 = vmatpush3.bf16.msra.mxu0 %v3300_v42 }
 0x560   :  { %3060 = vmatprep.subr.bf16.mxu0 %v3511_v1 }
 0x61f   :  { %v3036_v19 = vpop.f32.mrb[8].mxu1 }
 0x620   :  { %v754_v44 = vpop.f32.mrb[9].mxu1  ;;  %v771_v49 = vmul.f32 %v3036_v19, %v3795_v23 }
 0x621   :  { %v3037_v46 = vpop.f32.mrb[10].mxu1  ;;  %v769_v20 = vmul.f32 %v3777_v8, %v754_v44 }
 0x622   :  { %v757_v48 = vpop.f32.mrb[11].mxu1  ;;  %v772_v51 = vmul.f32 %v3037_v46, %v3798_v24 }
 0x623   :  { %v770_v30 = vmul.f32 %v3780_v9, %v757_v48 }
 0x625   :  { %v773_v50 = vadd.f32 %v770_v30, %v769_v20 }
 0x627   :  { %v774_v52 = vadd.f32 %v773_v50, %v771_v49  ;;  %v3042_v53 = vpop.f32.mrb[12].mxu1 }
 0x628   :  { %v833_v54 = vpop.f32.mrb[13].mxu1  ;;  %v850_v2 = vsel %vm59_vm12, %v3042_v53, -1e+30 }
 0x629   :  { %v3845_v55 = vadd.f32 %v774_v52, %v772_v51  ;;  %v848_v62 = vsel %vm59_vm12, %v833_v54, -1e+30  ;;  %v3043_v38 = vpop.f32.mrb[14].mxu1  ;;  %v858_v6 = vsel %vm663_vm13, %v850_v2, -inf }
 0x62a   :  { %v836_v63 = vpop.f32.mrb[15].mxu1  ;;  %v852_v0 = vsel %vm663_vm13, %v848_v62, -inf  ;;  %v851_v5 = vsel %vm59_vm12, %v3043_v38, -1e+30 }
 0x62b   :  { %v849_v3 = vsel %vm59_vm12, %v836_v63, -1e+30  ;;  %853 = vmax.xlane.f32.xlu0 %v852_v0  ;;  %v861_v7 = vsel %vm663_vm13, %v851_v5, -inf  ;;  %v3301_v63 = vld [vmem:[%s4387_s5 + $0x28] sm:$0xff]   ;;  %v3302_v0 = vld [vmem:[%s4387_s5 + $0x30] sm:$0xff]  }
 0x62c   :  { %v855_v4 = vsel %vm663_vm13, %v849_v3, -inf  ;;  %3061 = vmatpush3.bf16.msra.mxu0 %v3301_v63 }
 0x62d   :  { %856 = vmax.xlane.f32.xlu1 %v855_v4  ;;  %3062 = vmatprep.subr.bf16.mxu0 %v3511_v1 }
 0x62f   :  { %859 = vmax.xlane.f32.xlu0 %v858_v6 }
 0x630   :  { %3063 = vmatpush3.bf16.msra.mxu0 %v3302_v0 }
 0x631   :  { %862 = vmax.xlane.f32.xlu1 %v861_v7  ;;  %3064 = vmatprep.subr.bf16.mxu0 %v3511_v1 }
 0x6b8   :  { %v854_v10 = vpop.xlane.xlu0 %853 }
 0x6b9   :  { %v864_v11 = vsub.f32 %v848_v62, %v854_v10 }
 0x6ba   :  { %v857_v13 = vpop.xlane.xlu1 %856 }
 0x6bb   :  { %v868_v14 = vmul.f32 1.442695, %v864_v11  ;;  %v865_v15 = vsub.f32 %v849_v3, %v857_v13 }
 0x6bc   :  { %v860_v16 = vpop.xlane.xlu0 %859 }
 0x6bd   :  { %3408 = vpow2.f32 %v868_v14  ;;  %v870_v17 = vmul.f32 1.442695, %v865_v15  ;;  %v866_v21 = vsub.f32 %v850_v2, %v860_v16  ;;  %v3303_v2 = vld [vmem:[%s4387_s5 + $0x38] sm:$0xff]  }
 0x6be   :  { %v863_v22 = vpop.xlane.xlu1 %862  ;;  %3065 = vmatpush3.bf16.msra.mxu0 %v3303_v2  ;;  %v3960_v2 = vsub.s32 3, %v3631_v43 }
 0x6bf   :  { %3410 = vpow2.f32 %v870_v17  ;;  %v872_v25 = vmul.f32 1.442695, %v866_v21  ;;  %v867_v26 = vsub.f32 %v851_v5, %v863_v22  ;;  %3090 = vmatprep.subr.bf16.mxu0 %v3511_v1  ;;  %v1075_v21 = vsub.s32 4, %v3631_v43 }
 0x6c1   :  { %3412 = vpow2.f32 %v872_v25  ;;  %v874_v27 = vmul.f32 1.442695, %v867_v26  ;;  %v1076_v22 = vrot.slane %v3741_v39, %v1075_v21 }
 0x6c3   :  { %3414 = vpow2.f32 %v874_v27 }
 0x6c7   :  { %v3409_v28 = vpop.eup %3408 }
 0x6c8   :  { %v876_v29 = vsel %vm663_vm13, %v3409_v28, 0.0 }
 0x6c9   :  { %v3411_v31 = vpop.eup %3410  ;;  %877 = vadd.xlane.f32.xlu0 %v876_v29 }
 0x6ca   :  { %v879_v32 = vsel %vm663_vm13, %v3411_v31, 0.0 }
 0x6cb   :  { %v3413_v33 = vpop.eup %3412  ;;  %880 = vadd.xlane.f32.xlu1 %v879_v32 }
 0x6cc   :  { %v882_v34 = vsel %vm663_vm13, %v3413_v33, 0.0 }
 0x6cd   :  { %v3415_v35 = vpop.eup %3414  ;;  %883 = vadd.xlane.f32.xlu0 %v882_v34  ;;  %v3304_v34 = vld [vmem:[%s4388_s6] sm:$0xff]  }
 0x6ce   :  { %v885_v36 = vsel %vm663_vm13, %v3415_v35, 0.0 }
 0x6cf   :  { %886 = vadd.xlane.f32.xlu1 %v885_v36  ;;  %v3307_v36 = vld [vmem:[%s4388_s6 + $0x18] sm:$0xff]  }
 0x756   :  { %v878_v19 = vpop.xlane.xlu0 %877 }
 0x757   :  { %3416 = vrcp.f32 %v878_v19 }
 0x758   :  { %v881_v44 = vpop.xlane.xlu1 %880 }
 0x759   :  { %3418 = vrcp.f32 %v881_v44 }
 0x75a   :  { %v884_v46 = vpop.xlane.xlu0 %883 }
 0x75b   :  { %3420 = vrcp.f32 %v884_v46 }
 0x75c   :  { %v887_v48 = vpop.xlane.xlu1 %886 }
 0x75d   :  { %3422 = vrcp.f32 %v887_v48 }
 0x761   :  { %v3417_v20 = vpop.eup %3416 }
 0x762   :  { %v892_v49 = vmul.f32 %v3417_v20, %v3409_v28 }
 0x763   :  { %v3419_v30 = vpop.eup %3418 }
 0x764   :  { %v893_v50 = vmul.f32 %v3419_v30, %v3411_v31 }
 0x765   :  { %v3421_v51 = vpop.eup %3420 }
 0x766   :  { %v896_v52 = vpack.c.bf16 %v893_v50, %v892_v49  ;;  %v894_v54 = vmul.f32 %v3421_v51, %v3413_v33 }
 0x767   :  { %v3423_v53 = vpop.eup %3422 }
 0x768   :  { %v895_v62 = vmul.f32 %v3423_v53, %v3415_v35  ;;  %3046 = vmatprep.mubr.msk.bf16.mxu1 %vm663_vm13, %v896_v52  ;;  %v3306_v35 = vld [vmem:[%s4388_s6 + $0x10] sm:$0xff]  }
 0x76a   :  { %v897_v38 = vpack.c.bf16 %v895_v62, %v894_v54 }
 0x76c   :  { %3047 = vmatmul.mubr.msk.bf16.vlgmr.msra.gmra.mrb[16].mxu1 %vm663_vm13, %v897_v38  ;;  %v3954_v38 = vsub.s32 2, %v3631_v43 }
 0x76d   :  { %3086 = vmatprep.mubr.msk.bf16.mxu1 %vm3513_vm0, %v3511_v1  ;;  %3071 = vmatpush3.bf16.msra.mxu1 %v3304_v34 }
 0x76e   :  { %3072 = vmatprep.subr.bf16.mxu1 %v3511_v1  ;;  %v1108_v0 = vrot.slane %v3741_v39, %v3954_v38 }
 0x83f   :  { %v3048_v3 = vpop.f32.mrb[16].mxu1 }
 0x840   :  { %v943_v4 = vpop.f32.mrb[17].mxu1  ;;  %v960_v11 = vmul.f32 %v3048_v3, %v3795_v23 }
 0x841   :  { %v3049_v5 = vpop.f32.mrb[18].mxu1  ;;  %v958_v7 = vmul.f32 %v3777_v8, %v943_v4 }
 0x842   :  { %v946_v6 = vpop.f32.mrb[19].mxu1  ;;  %v961_v14 = vmul.f32 %v3049_v5, %v3798_v24 }
 0x843   :  { %v959_v10 = vmul.f32 %v3780_v9, %v946_v6 }
 0x845   :  { %v962_v13 = vadd.f32 %v959_v10, %v958_v7 }
 0x847   :  { %v963_v15 = vadd.f32 %v962_v13, %v960_v11  ;;  %v1114_v11 = vrot.slane %v3741_v39, %v3960_v2 }
 0x849   :  { %v964_v16 = vadd.f32 %v963_v15, %v961_v14 }
 0x84b   :  { %v965_v17 = vpack.c.bf16 %v964_v16, %v3845_v55 }
 0x84d   :  { %3067 = vmatmul.mubr.bf16.vlgmr.msra.gmra.mrb[8].mxu0 %v965_v17  ;;  %v3312_v17 = vld [vmem:[%s4389_s7] sm:$0xff]  }
 0x84e   :  { %3106 = vmatprep.mubr.msk.bf16.mxu0 %vm3513_vm0, %v3511_v1  ;;  %3091 = vmatpush3.bf16.msra.mxu0 %v3312_v17  ;;  %v3332_v17 = vld [vmem:[%s4386_s4 + $0x108] ss:$12 sps:$4 sm:$0xff]  }
 0x84f   :  { %3092 = vmatprep.subr.bf16.mxu0 %v3511_v1 }
 0x920   :  { %v1064_v25 = vpop.f32.mrb[8].mxu0 }
 0x921   :  { %v1071_v26 = vadd.f32 %v1064_v25, %v3644_v56  ;;  %v3068_v27 = vpop.f32.mrb[9].mxu0  ;;  %v3314_v25 = vld [vmem:[%s4389_s7 + $0x10] sm:$0xff]  }
 0x922   :  { %v1067_v28 = vpop.f32.mrb[10].mxu0  ;;  %v3317_v27 = vld [vmem:[%s4389_s7 + $0x28] sm:$0xff]  }
 0x923   :  { %v3911_v29 = vadd.f32 %v1076_v22, %v1071_v26  ;;  %v1072_v31 = vadd.f32 %v1067_v28, %v3647_v59  ;;  %v3069_v55 = vpop.f32.mrb[11].mxu0  ;;  %v3305_v59 = vld [vmem:[%s4388_s6 + $0x8] sm:$0xff]   ;;  %v3316_v26 = vld [vmem:[%s4389_s7 + $0x20] sm:$0xff]   ;;  %v3318_v28 = vld [vmem:[%s4389_s7 + $0x30] sm:$0xff]  }
 0x924   :  { %3073 = vmatpush3.bf16.msra.mxu1 %v3305_v59  ;;  %v1137_v55 = vrot.slane %v3758_v60, %v3640_v47 }
 0x925   :  { %v3914_v32 = vadd.f32 %v1076_v22, %v1072_v31  ;;  %1079 = vadd.xlane.f32.xlu0 %v3911_v29  ;;  %v1085_v33 = vmul.f32 %v3911_v29, %v3911_v29  ;;  %3074 = vmatprep.subr.bf16.mxu1 %v3511_v1  ;;  %v3313_v22 = vld [vmem:[%s4389_s7 + $0x8] sm:$0xff]   ;;  %v3319_v31 = vld [vmem:[%s4389_s7 + $0x38] sm:$0xff]  }
 0x926   :  { %3093 = vmatpush3.bf16.msra.mxu0 %v3313_v22  ;;  %v3335_v22 = vld [vmem:[%s4386_s4 + $0x110] ss:$12 sps:$4 sm:$0xff]  }
 0x927   :  { %1081 = vadd.xlane.f32.xlu1 %v3914_v32  ;;  %v1086_v56 = vmul.f32 %v3914_v32, %v3914_v32  ;;  %3094 = vmatprep.subr.bf16.mxu0 %v3511_v1 }
 0x928   :  { %3075 = vmatpush3.bf16.msra.mxu1 %v3306_v35 }
 0x929   :  { %1087 = vadd.xlane.f32.xlu0 %v1085_v33  ;;  %3076 = vmatprep.subr.bf16.mxu1 %v3511_v1 }
 0x92a   :  { %3095 = vmatpush3.bf16.msra.mxu0 %v3314_v25  ;;  %v3338_v25 = vld [vmem:[%s4386_s4 + $0x124] ss:$12 sps:$4 sm:$0xff]  }
 0x92b   :  { %1089 = vadd.xlane.f32.xlu1 %v1086_v56  ;;  %3096 = vmatprep.subr.bf16.mxu0 %v3511_v1 }
 0x92c   :  { %3077 = vmatpush3.bf16.msra.mxu1 %v3307_v36 }
 0x92d   :  { %3078 = vmatprep.subr.bf16.mxu1 %v3511_v1 }
 0x930   :  { %3079 = vmatpush3.bf16.msra.mxu1 %v3308_v37 }
 0x931   :  { %3080 = vmatprep.subr.bf16.mxu1 %v3511_v1 }
 0x934   :  { %3081 = vmatpush3.bf16.msra.mxu1 %v3309_v12 }
 0x935   :  { %3082 = vmatprep.subr.bf16.mxu1 %v3511_v1 }
 0x938   :  { %3083 = vmatpush3.bf16.msra.mxu1 %v3310_v40 }
 0x939   :  { %3084 = vmatprep.subr.bf16.mxu1 %v3511_v1 }
 0x93c   :  { %3085 = vmatpush3.bf16.msra.mxu1 %v3311_v41 }
 0x9b2   :  { %v1080_v42 = vpop.xlane.xlu0 %1079 }
 0x9b3   :  { %v1083_v19 = vmul.f32 0.03125, %v1080_v42 }
 0x9b4   :  { %v1082_v44 = vpop.xlane.xlu1 %1081 }
 0x9b5   :  { %v1084_v46 = vmul.f32 0.03125, %v1082_v44  ;;  %v1093_v20 = vmul.f32 %v1083_v19, %v1083_v19  ;;  %v1097_v63 = vsub.f32 %v3911_v29, %v1083_v19 }
 0x9b6   :  { %v1088_v48 = vpop.xlane.xlu0 %1087 }
 0x9b7   :  { %v1091_v30 = vmul.f32 0.03125, %v1088_v48  ;;  %v1094_v50 = vmul.f32 %v1084_v46, %v1084_v46  ;;  %v1098_v4 = vsub.f32 %v3914_v32, %v1084_v46 }
 0x9b8   :  { %v1090_v49 = vpop.xlane.xlu1 %1089 }
 0x9b9   :  { %v1095_v51 = vsub.f32 %v1091_v30, %v1093_v20  ;;  %v1092_v52 = vmul.f32 0.03125, %v1090_v49 }
 0x9bb   :  { %v1099_v53 = vadd.f32 1e-05, %v1095_v51  ;;  %v1096_v54 = vsub.f32 %v1092_v52, %v1094_v50  ;;  %v3320_v50 = vld [vmem:[%s4386_s4 + $0xc0] ss:$12 sps:$4 sm:$0xff]   ;;  %v3322_v51 = vld [vmem:[%s4386_s4 + $0xc4] ss:$12 sps:$4 sm:$0xff]  }
 0x9bc   :  { %1560 = vmatprep.subr.bf16.mxu1 %v3322_v51  ;;  %v1353_v52 = vsub.s32 5, %v3631_v43 }
 0x9bd   :  { %3424 = vrsqrt.f32 %v1099_v53  ;;  %v1100_v62 = vadd.f32 1e-05, %v1096_v54 }
 0x9be   :  { %v1354_v53 = vrot.slane %v3741_v39, %v1353_v52 }
 0x9bf   :  { %3426 = vrsqrt.f32 %v1100_v62 }
 0x9c7   :  { %v3425_v3 = vpop.eup %3424 }
 0x9c8   :  { %v1103_v5 = vmul.f32 %v3425_v3, %v1097_v63 }
 0x9c9   :  { %v3427_v6 = vpop.eup %3426 }
 0x9ca   :  { %v1104_v7 = vmul.f32 %v3427_v6, %v1098_v4  ;;  %v1109_v10 = vmul.f32 %v1108_v0, %v1103_v5 }
 0x9cc   :  { %v1110_v13 = vmul.f32 %v1108_v0, %v1104_v7  ;;  %v1115_v14 = vadd.f32 %v1114_v11, %v1109_v10  ;;  %v3324_v10 = vld [vmem:[%s4386_s4 + $0xd8] ss:$12 sps:$4 sm:$0xff]  }
 0x9ce   :  { %v1116_v15 = vadd.f32 %v1114_v11, %v1110_v13  ;;  %v3327_v11 = vld [vmem:[%s4386_s4 + $0xe0] ss:$12 sps:$4 sm:$0xff]  }
 0x9cf   :  { %v3330_v13 = vld [vmem:[%s4386_s4 + $0xf4] ss:$12 sps:$4 sm:$0xff]  }
 0x9d0   :  { %v1117_v16 = vpack.c.bf16 %v1116_v15, %v1115_v14  ;;  %v3328_v14 = vld [vmem:[%s4386_s4 + $0xf0] ss:$12 sps:$4 sm:$0xff]   ;;  %v3331_v15 = vld [vmem:[%s4386_s4 + $0xf8] ss:$12 sps:$4 sm:$0xff]  }
 0x9d2   :  { %3087 = vmatmul.mubr.bf16.vlgmr.msra.gmra.mrb[20].mxu1 %v1117_v16  ;;  %v3334_v16 = vld [vmem:[%s4386_s4 + $0x10c] ss:$12 sps:$4 sm:$0xff]  }
 0x9d3   :  { %1592 = vmatprep.mubr.bf16.mxu1 %v3512_v18  ;;  %v3315_v18 = vld [vmem:[%s4389_s7 + $0x18] sm:$0xff]   ;;  %1561 = vmatpush1.bf16.msra.mxu1 %v3320_v50  ;;  %v4101_v50 = vld [vmem:[%s4390_s8 + $0x10] sm:$0xff] }
 0x9d4   :  { %3097 = vmatpush3.bf16.msra.mxu0 %v3315_v18  ;;  %v3336_v18 = vld [vmem:[%s4386_s4 + $0x120] ss:$12 sps:$4 sm:$0xff]  }
 0x9d5   :  { %3098 = vmatprep.subr.bf16.mxu0 %v3511_v1 }
 0x9d8   :  { %3099 = vmatpush3.bf16.msra.mxu0 %v3316_v26  ;;  %v3339_v26 = vld [vmem:[%s4386_s4 + $0x128] ss:$12 sps:$4 sm:$0xff]  }
 0x9d9   :  { %3100 = vmatprep.subr.bf16.mxu0 %v3511_v1 }
 0x9dc   :  { %3101 = vmatpush3.bf16.msra.mxu0 %v3317_v27  ;;  %v3342_v27 = vld [vmem:[%s4386_s4 + $0x13c] ss:$12 sps:$4 sm:$0xff]  }
 0x9dd   :  { %3102 = vmatprep.subr.bf16.mxu0 %v3511_v1 }
 0x9e0   :  { %3103 = vmatpush3.bf16.msra.mxu0 %v3318_v28  ;;  %v3340_v28 = vld [vmem:[%s4386_s4 + $0x138] ss:$12 sps:$4 sm:$0xff]  }
 0x9e1   :  { %3104 = vmatprep.subr.bf16.mxu0 %v3511_v1 }
 0x9e4   :  { %3105 = vmatpush3.bf16.msra.mxu0 %v3319_v31  ;;  %v3343_v31 = vld [vmem:[%s4386_s4 + $0x140] ss:$12 sps:$4 sm:$0xff]  }
 0x9e5   :  { %3110 = vmatprep.subr.bf16.mxu0 %v3511_v1 }
 0xaa5   :  { %v1220_v33 = vpop.f32.mrb[20].mxu1 }
 0xaa6   :  { %v1221_v56 = vadd.f32 %v1220_v33, %v1137_v55  ;;  %v3088_v34 = vpop.f32.mrb[21].mxu1  ;;  %v3344_v33 = vld [vmem:[%s4386_s4 + $0x150] ss:$12 sps:$4 sm:$0xff]  }
 0xaa7   :  { %v1223_v59 = vpop.f32.mrb[22].mxu1  ;;  %v3350_v34 = vld [vmem:[%s4386_s4 + $0x16c] ss:$12 sps:$4 sm:$0xff]  }
 0xaa8   :  { %v2711_v35 = vmul.f32 -1.702, %v1221_v56  ;;  %v1224_v36 = vadd.f32 %v1223_v59, %v1137_v55  ;;  %v3089_v37 = vpop.f32.mrb[23].mxu1  ;;  %v3346_v55 = vld [vmem:[%s4386_s4 + $0x154] ss:$12 sps:$4 sm:$0xff]  }
 0xaa9   :  { %v3348_v59 = vld [vmem:[%s4386_s4 + $0x168] ss:$12 sps:$4 sm:$0xff]  }
 0xaaa   :  { %v1231_v12 = vmul.f32 1.442695, %v2711_v35  ;;  %v2712_v40 = vmul.f32 -1.702, %v1224_v36  ;;  %v3351_v35 = vld [vmem:[%s4386_s4 + $0x170] ss:$12 sps:$4 sm:$0xff]  }
 0xaac   :  { %3428 = vpow2.f32 %v1231_v12  ;;  %v1233_v41 = vmul.f32 1.442695, %v2712_v40 }
 0xaae   :  { %3430 = vpow2.f32 %v1233_v41 }
 0xab6   :  { %v3429_v42 = vpop.eup %3428 }
 0xab7   :  { %v1235_v19 = vadd.f32 1.0, %v3429_v42 }
 0xab8   :  { %v3431_v44 = vpop.eup %3430 }
 0xab9   :  { %3432 = vrcp.f32 %v1235_v19  ;;  %v1236_v46 = vadd.f32 1.0, %v3431_v44 }
 0xabb   :  { %3434 = vrcp.f32 %v1236_v46 }
 0xac3   :  { %v3433_v48 = vpop.eup %3432 }
 0xac4   :  { %v1241_v20 = vmul.f32 %v3433_v48, %v1221_v56  ;;  %v3347_v56 = vld [vmem:[%s4386_s4 + $0x158] ss:$12 sps:$4 sm:$0xff]  }
 0xac5   :  { %v3435_v60 = vpop.eup %3434 }
 0xac6   :  { %v1242_v30 = vmul.f32 %v3435_v60, %v1224_v36 }
 0xac8   :  { %v1243_v49 = vpack.c.bf16 %v1242_v30, %v1241_v20 }
 0xaca   :  { %3107 = vmatmul.mubr.bf16.vlgmr.msra.gmra.mrb[12].mxu0 %v1243_v49 }
 0xacb   :  { %3126 = vmatprep.mubr.msk.bf16.mxu0 %vm3513_vm0, %v3511_v1 }
 0xb9d   :  { %v1342_v54 = vpop.f32.mrb[12].mxu0 }
 0xb9e   :  { %v1349_v62 = vadd.f32 %v1342_v54, %v3911_v29  ;;  %v3108_v63 = vpop.f32.mrb[13].mxu0  ;;  %v3323_v29 = vld [vmem:[%s4386_s4 + $0xc8] ss:$12 sps:$4 sm:$0xff]  }
 0xb9f   :  { %v1345_v0 = vpop.f32.mrb[14].mxu0  ;;  %3111 = vmatpush3.bf16.msra.mxu0 %v3323_v29 }
 0xba0   :  { %v4013_v3 = vadd.f32 %v1354_v53, %v1349_v62  ;;  %v1350_v4 = vadd.f32 %v1345_v0, %v3914_v32  ;;  %v3109_v5 = vpop.f32.mrb[15].mxu0  ;;  %v3326_v32 = vld [vmem:[%s4386_s4 + $0xdc] ss:$12 sps:$4 sm:$0xff]   ;;  %3112 = vmatprep.subr.bf16.mxu0 %v3511_v1 }
 0xba1   :  { %1562 = vmatprep.subr.bf16.mxu1 %v3326_v32 }
 0xba2   :  { %v4016_v6 = vadd.f32 %v1354_v53, %v1350_v4  ;;  %1360 = vadd.xlane.f32.xlu0 %v4013_v3  ;;  %v1366_v7 = vmul.f32 %v4013_v3, %v4013_v3  ;;  %1563 = vmatpush1.bf16.msra.mxu1 %v3324_v10  ;;  %v1389_v53 = vrot.slane %v4101_v50, %v3634_v45 }
 0xba3   :  { %3113 = vmatpush3.bf16.msra.mxu0 %v3327_v11  ;;  %1564 = vmatprep.subr.bf16.mxu1 %v3330_v13  ;;  %v4114_v11 = vld [vmem:[%s4390_s8 + $0x18] sm:$0x3]  ;;  %v1647_v13 = vrot.slane %v4101_v50, %v568_v58 }
 0xba4   :  { %1362 = vadd.xlane.f32.xlu1 %v4016_v6  ;;  %v1367_v39 = vmul.f32 %v4016_v6, %v4016_v6  ;;  %3114 = vmatprep.subr.bf16.mxu0 %v3511_v1 }
 0xba6   :  { %1368 = vadd.xlane.f32.xlu0 %v1366_v7  ;;  %1565 = vmatpush1.bf16.msra.mxu1 %v3328_v14  ;;  %v1395_v7 = vrot.slane %v4101_v50, %v3640_v47  ;;  %v1662_v14 = vrot.slane %v4114_v11, %v3634_v45 }
 0xba7   :  { %3115 = vmatpush3.bf16.msra.mxu0 %v3331_v15  ;;  %1566 = vmatprep.subr.bf16.mxu1 %v3334_v16 }
 0xba8   :  { %1370 = vadd.xlane.f32.xlu1 %v1367_v39  ;;  %3116 = vmatprep.subr.bf16.mxu0 %v3511_v1 }
 0xbaa   :  { %1567 = vmatpush1.bf16.msra.mxu1 %v3332_v17  ;;  %v1655_v17 = vrot.slane %v4101_v50, %v576_v61 }
 0xbab   :  { %3117 = vmatpush3.bf16.msra.mxu0 %v3335_v22  ;;  %1568 = vmatprep.subr.bf16.mxu1 %v3338_v25 }
 0xbac   :  { %3118 = vmatprep.subr.bf16.mxu0 %v3511_v1 }
 0xbae   :  { %1569 = vmatpush1.bf16.msra.mxu1 %v3336_v18 }
 0xbaf   :  { %3119 = vmatpush3.bf16.msra.mxu0 %v3339_v26  ;;  %1570 = vmatprep.subr.bf16.mxu1 %v3342_v27 }
 0xbb0   :  { %3120 = vmatprep.subr.bf16.mxu0 %v3511_v1 }
 0xbb2   :  { %1571 = vmatpush1.bf16.msra.mxu1 %v3340_v28 }
 0xbb3   :  { %3121 = vmatpush3.bf16.msra.mxu0 %v3343_v31  ;;  %1572 = vmatprep.subr.bf16.mxu1 %v3346_v55 }
 0xbb4   :  { %3122 = vmatprep.subr.bf16.mxu0 %v3511_v1 }
 0xbb6   :  { %1573 = vmatpush1.bf16.msra.mxu1 %v3344_v33 }
 0xbb7   :  { %3123 = vmatpush3.bf16.msra.mxu0 %v3347_v56  ;;  %1574 = vmatprep.subr.bf16.mxu1 %v3350_v34 }
 0xbb8   :  { %3124 = vmatprep.subr.bf16.mxu0 %v3511_v1 }
 0xbba   :  { %1575 = vmatpush1.bf16.msra.mxu1 %v3348_v59 }
 0xbbb   :  { %3125 = vmatpush3.bf16.msra.mxu0 %v3351_v35 }
 0xbbc   :  { %3154 = vmatprep.subr.bf16.mxu0 %v3511_v1 }
 0xc2f   :  { %v1361_v36 = vpop.xlane.xlu0 %1360 }
 0xc30   :  { %v1364_v37 = vmul.f32 0.03125, %v1361_v36 }
 0xc31   :  { %v1363_v12 = vpop.xlane.xlu1 %1362 }
 0xc32   :  { %v1365_v40 = vmul.f32 0.03125, %v1363_v12  ;;  %v1374_v42 = vmul.f32 %v1364_v37, %v1364_v37  ;;  %v1378_v51 = vsub.f32 %v4013_v3, %v1364_v37 }
 0xc33   :  { %v1369_v41 = vpop.xlane.xlu0 %1368 }
 0xc34   :  { %v1372_v19 = vmul.f32 0.03125, %v1369_v41  ;;  %v1375_v46 = vmul.f32 %v1365_v40, %v1365_v40  ;;  %v1379_v62 = vsub.f32 %v4016_v6, %v1365_v40 }
 0xc35   :  { %v1371_v44 = vpop.xlane.xlu1 %1370 }
 0xc36   :  { %v1376_v48 = vsub.f32 %v1372_v19, %v1374_v42  ;;  %v1373_v60 = vmul.f32 0.03125, %v1371_v44 }
 0xc38   :  { %v1380_v20 = vadd.f32 1e-05, %v1376_v48  ;;  %v1377_v30 = vsub.f32 %v1373_v60, %v1375_v46 }
 0xc3a   :  { %3436 = vrsqrt.f32 %v1380_v20  ;;  %v1381_v49 = vadd.f32 1e-05, %v1377_v30 }
 0xc3c   :  { %3438 = vrsqrt.f32 %v1381_v49 }
 0xc44   :  { %v3437_v54 = vpop.eup %3436 }
 0xc45   :  { %v1384_v63 = vmul.f32 %v3437_v54, %v1378_v51 }
 0xc46   :  { %v3439_v0 = vpop.eup %3438 }
 0xc47   :  { %v1385_v4 = vmul.f32 %v3439_v0, %v1379_v62  ;;  %v1390_v5 = vmul.f32 %v1389_v53, %v1384_v63 }
 0xc49   :  { %v1391_v39 = vmul.f32 %v1389_v53, %v1385_v4  ;;  %v1396_v29 = vadd.f32 %v1395_v7, %v1390_v5 }
 0xc4b   :  { %v1397_v32 = vadd.f32 %v1395_v7, %v1391_v39 }
 0xc4d   :  { %v1398_v10 = vpack.c.bf16 %v1397_v32, %v1396_v29 }
 0xc4f   :  { %1593 = vmatmul.mubr.bf16.vlgmr.msra.gmra.mrb[24].mxu1 %v1398_v10  ;;  %3127 = vmatmul.mubr.bf16.vlgmr.msra.gmra.mrb[16].mxu0 %v1398_v10 }
 0xc50   :  { %3170 = vmatprep.mubr.msk.bf16.mxu0 %vm3513_vm0, %v3511_v1 }
 0xd22   :  { %v1594_v15 = vpop.f32.mrb[24].mxu1  ;;  %v1637_v16 = vpop.f32.mrb[16].mxu0 }
 0xd23   :  { %v1648_v22 = vadd.f32 %v1647_v13, %v1594_v15  ;;  %v1596_v25 = vpop.f32.mrb[25].mxu1  ;;  %v3128_v18 = vpop.f32.mrb[17].mxu0  ;;  %v1663_v31 = vadd.f32 %v1662_v14, %v1637_v16 }
 0xd24   :  { %v1598_v26 = vpop.f32.mrb[26].mxu1  ;;  %v1640_v27 = vpop.f32.mrb[18].mxu0  ;;  %v1656_v34 = vadd.f32 %v1655_v17, %v1596_v25 }
 0xd25   :  { %v1650_v28 = vmul.f32 0.35355338, %v1648_v22  ;;  %v4124_v55 = vadd.f32 %v1647_v13, %v1598_v26  ;;  %v1664_v33 = vadd.f32 %v1662_v14, %v1640_v27  ;;  %v1600_v58 = vpop.f32.mrb[27].mxu1  ;;  %v3129_v56 = vpop.f32.mrb[19].mxu0 }
 0xd26   :  { %v1657_v45 = vadd.f32 %v1655_v17, %v1600_v58 }
 0xd27   :  { %v4126_v59 = vpack.c.bf16 %v1664_v33, %v1663_v31  ;;  %v1666_v61 = vmul.f32 %v3777_v8, %v1650_v28  ;;  %v1667_v36 = vmul.f32 %v3780_v9, %v1650_v28  ;;  %v1668_v12 = vmul.f32 %v3795_v23, %v1650_v28 }
 0xd28   :  { %v4128_v35 = vpack.c.bf16 %v1657_v45, %v1656_v34  ;;  %v1669_v40 = vmul.f32 %v3798_v24, %v1650_v28 }
 0xd29   :  { %v2875_v37 = vpack.c.bf16 %v1667_v36, %v1666_v61  ;;  %v1792_v42 = vsel %vm716_vm11, %v4126_v59, 0  ;;  %v1651_v36 = vmul.f32 0.35355338, %v4124_v55 }
 0xd2a   :  { %3130 = vmatprep.subr.bf16.mxu1 %v4128_v35  ;;  %v2876_v41 = vpack.c.bf16 %v1669_v40, %v1668_v12  ;;  %v1871_v19 = vrot.slane %v4128_v35, 4 }
 0xd2b   :  { %3131 = vmatpush3.bf16.xpose.msra.mxu1 %v4128_v35  ;;  %3132 = vmatprep.mubr.bf16.mxu1 %v2875_v37  ;;  %v1852_v55 = vmul.f32 %v3795_v23, %v1651_v36 }
 0xd2c   :  { %3236 = vmatprep.subr.msk.bf16.mxu1 %vm716_vm11, %v4126_v59 }
 0xd32   :  { %3133 = vmatmul.mubr.bf16.vlgmr.msra.gmra.mrb[28].mxu1 %v2876_v41 }
 0xd33   :  { %3137 = vmatpush3.bf16.msra.mxu1 %v1792_v42 }
 0xd34   :  { %3142 = vmatprep.subr.bf16.mxu1 %v1871_v19 }
 0xe05   :  { %v3134_v44 = vpop.f32.mrb[28].mxu1 }
 0xe06   :  { %v1720_v46 = vpop.f32.mrb[29].mxu1  ;;  %v1737_v49 = vsel %vm59_vm12, %v3134_v44, -1e+30  ;;  %v1850_v44 = vmul.f32 %v3777_v8, %v1651_v36 }
 0xe07   :  { %v1735_v48 = vsel %vm59_vm12, %v1720_v46, -1e+30  ;;  %v3135_v60 = vpop.f32.mrb[30].mxu1  ;;  %v1745_v62 = vsel %vm663_vm13, %v1737_v49, -inf  ;;  %v1851_v46 = vmul.f32 %v3780_v9, %v1651_v36 }
 0xe08   :  { %v1723_v20 = vpop.f32.mrb[31].mxu1  ;;  %v1739_v30 = vsel %vm663_vm13, %v1735_v48, -inf  ;;  %v1738_v54 = vsel %vm59_vm12, %v3135_v60, -1e+30 }
 0xe09   :  { %v1736_v51 = vsel %vm59_vm12, %v1723_v20, -1e+30  ;;  %1740 = vmax.xlane.f32.xlu0 %v1739_v30  ;;  %v1748_v63 = vsel %vm663_vm13, %v1738_v54, -inf  ;;  %v2877_v30 = vpack.c.bf16 %v1851_v46, %v1850_v44 }
 0xe0a   :  { %v1742_v53 = vsel %vm663_vm13, %v1736_v51, -inf }
 0xe0b   :  { %1743 = vmax.xlane.f32.xlu1 %v1742_v53 }
 0xe0d   :  { %1746 = vmax.xlane.f32.xlu0 %v1745_v62 }
 0xe0f   :  { %1749 = vmax.xlane.f32.xlu1 %v1748_v63 }
 0xe96   :  { %v1741_v0 = vpop.xlane.xlu0 %1740 }
 0xe97   :  { %v1751_v4 = vsub.f32 %v1735_v48, %v1741_v0 }
 0xe98   :  { %v1744_v5 = vpop.xlane.xlu1 %1743 }
 0xe99   :  { %v1755_v7 = vmul.f32 1.442695, %v1751_v4  ;;  %v1752_v39 = vsub.f32 %v1736_v51, %v1744_v5  ;;  %v1853_v51 = vmul.f32 %v3798_v24, %v1651_v36 }
 0xe9a   :  { %v1747_v29 = vpop.xlane.xlu0 %1746 }
 0xe9b   :  { %3440 = vpow2.f32 %v1755_v7  ;;  %v1757_v32 = vmul.f32 1.442695, %v1752_v39  ;;  %v1753_v10 = vsub.f32 %v1737_v49, %v1747_v29  ;;  %v1973_v49 = vrot.slane %v4126_v59, 4 }
 0xe9c   :  { %v1750_v13 = vpop.xlane.xlu1 %1749  ;;  %v2878_v53 = vpack.c.bf16 %v1853_v51, %v1852_v55  ;;  %v3354_v55 = vld [vmem:[%s4387_s5 + $0x50] sm:$0xff]   ;;  %v3355_v51 = vld [vmem:[%s4387_s5 + $0x58] sm:$0xff]  }
 0xe9d   :  { %3442 = vpow2.f32 %v1757_v32  ;;  %v1759_v14 = vmul.f32 1.442695, %v1753_v10  ;;  %v1754_v15 = vsub.f32 %v1738_v54, %v1750_v13  ;;  %v1981_v54 = vsel %vm716_vm11, %v1973_v49, 0 }
 0xe9f   :  { %3444 = vpow2.f32 %v1759_v14  ;;  %v1761_v16 = vmul.f32 1.442695, %v1754_v15 }
 0xea1   :  { %3446 = vpow2.f32 %v1761_v16 }
 0xea5   :  { %v3441_v17 = vpop.eup %3440 }
 0xea6   :  { %v1763_v22 = vsel %vm663_vm13, %v3441_v17, 0.0 }
 0xea7   :  { %v3443_v25 = vpop.eup %3442  ;;  %1764 = vadd.xlane.f32.xlu0 %v1763_v22 }
 0xea8   :  { %v1766_v18 = vsel %vm663_vm13, %v3443_v25, 0.0 }
 0xea9   :  { %v3445_v26 = vpop.eup %3444  ;;  %1767 = vadd.xlane.f32.xlu1 %v1766_v18 }
 0xeaa   :  { %v1769_v27 = vsel %vm663_vm13, %v3445_v26, 0.0 }
 0xeab   :  { %v3447_v28 = vpop.eup %3446  ;;  %1770 = vadd.xlane.f32.xlu0 %v1769_v27 }
 0xeac   :  { %v1772_v31 = vsel %vm663_vm13, %v3447_v28, 0.0 }
 0xead   :  { %1773 = vadd.xlane.f32.xlu1 %v1772_v31 }
 0xf34   :  { %v1765_v33 = vpop.xlane.xlu0 %1764 }
 0xf35   :  { %3448 = vrcp.f32 %v1765_v33 }
 0xf36   :  { %v1768_v58 = vpop.xlane.xlu1 %1767 }
 0xf37   :  { %3450 = vrcp.f32 %v1768_v58 }
 0xf38   :  { %v1771_v56 = vpop.xlane.xlu0 %1770 }
 0xf39   :  { %3452 = vrcp.f32 %v1771_v56 }
 0xf3a   :  { %v1774_v34 = vpop.xlane.xlu1 %1773 }
 0xf3b   :  { %3454 = vrcp.f32 %v1774_v34 }
 0xf3f   :  { %v3449_v45 = vpop.eup %3448 }
 0xf40   :  { %v1779_v37 = vmul.f32 %v3449_v45, %v3441_v17 }
 0xf41   :  { %v3451_v61 = vpop.eup %3450 }
 0xf42   :  { %v1780_v12 = vmul.f32 %v3451_v61, %v3443_v25 }
 0xf43   :  { %v3453_v40 = vpop.eup %3452 }
 0xf44   :  { %v1783_v41 = vpack.c.bf16 %v1780_v12, %v1779_v37  ;;  %v1781_v48 = vmul.f32 %v3453_v40, %v3445_v26 }
 0xf45   :  { %v3455_v42 = vpop.eup %3454 }
 0xf46   :  { %v1782_v60 = vmul.f32 %v3455_v42, %v3447_v28  ;;  %3138 = vmatprep.mubr.msk.bf16.mxu1 %vm663_vm13, %v1783_v41 }
 0xf48   :  { %v1784_v20 = vpack.c.bf16 %v1782_v60, %v1781_v48 }
 0xf4a   :  { %3139 = vmatmul.mubr.msk.bf16.vlgmr.msra.gmra.mrb[32].mxu1 %vm663_vm13, %v1784_v20 }
 0xf4b   :  { %3143 = vmatpush3.bf16.xpose.msra.mxu1 %v1871_v19  ;;  %3144 = vmatprep.mubr.bf16.mxu1 %v2877_v30  ;;  %v3352_v30 = vld [vmem:[%s4387_s5 + $0x40] sm:$0xff]  }
 0xf4c   :  { %3237 = vmatprep.subr.msk.bf16.mxu1 %vm716_vm11, %v1973_v49  ;;  %3155 = vmatpush3.bf16.msra.mxu0 %v3352_v30  ;;  %v3353_v49 = vld [vmem:[%s4387_s5 + $0x48] sm:$0xff]  }
 0xf4d   :  { %3156 = vmatprep.subr.bf16.mxu0 %v3511_v1 }
 0xf50   :  { %3157 = vmatpush3.bf16.msra.mxu0 %v3353_v49 }
 0xf51   :  { %3158 = vmatprep.subr.bf16.mxu0 %v3511_v1 }
 0xf52   :  { %3145 = vmatmul.mubr.bf16.vlgmr.msra.gmra.mrb[36].mxu1 %v2878_v53  ;;  %v3356_v53 = vld [vmem:[%s4387_s5 + $0x60] sm:$0xff]  }
 0xf53   :  { %3149 = vmatpush3.bf16.msra.mxu1 %v1981_v54 }
 0xf54   :  { %3174 = vmatprep.subr.bf16.mxu1 %v3511_v1  ;;  %3159 = vmatpush3.bf16.msra.mxu0 %v3354_v55 }
 0xf55   :  { %3160 = vmatprep.subr.bf16.mxu0 %v3511_v1 }
 0xf58   :  { %3161 = vmatpush3.bf16.msra.mxu0 %v3355_v51 }
 0xf59   :  { %3162 = vmatprep.subr.bf16.mxu0 %v3511_v1 }
 0xf5c   :  { %3163 = vmatpush3.bf16.msra.mxu0 %v3356_v53 }
 0xf5d   :  { %3164 = vmatprep.subr.bf16.mxu0 %v3511_v1 }
0x101d   :  { %v3140_v59 = vpop.f32.mrb[32].mxu1 }
0x101e   :  { %v1828_v62 = vpop.f32.mrb[33].mxu1  ;;  %v1845_v4 = vmul.f32 %v3140_v59, %v3795_v23 }
0x101f   :  { %v3141_v63 = vpop.f32.mrb[34].mxu1  ;;  %v1843_v35 = vmul.f32 %v3777_v8, %v1828_v62 }
0x1020   :  { %v1831_v0 = vpop.f32.mrb[35].mxu1  ;;  %v1846_v7 = vmul.f32 %v3141_v63, %v3798_v24 }
0x1021   :  { %v1844_v19 = vmul.f32 %v3780_v9, %v1831_v0 }
0x1023   :  { %v1847_v5 = vadd.f32 %v1844_v19, %v1843_v35 }
0x1025   :  { %v1848_v39 = vadd.f32 %v1847_v5, %v1845_v4  ;;  %v3146_v29 = vpop.f32.mrb[36].mxu1 }
0x1026   :  { %v1907_v32 = vpop.f32.mrb[37].mxu1  ;;  %v1924_v17 = vsel %vm59_vm12, %v3146_v29, -1e+30 }
0x1027   :  { %v4176_v10 = vadd.f32 %v1848_v39, %v1846_v7  ;;  %v1922_v13 = vsel %vm59_vm12, %v1907_v32, -1e+30  ;;  %v3147_v14 = vpop.f32.mrb[38].mxu1  ;;  %v1932_v26 = vsel %vm663_vm13, %v1924_v17, -inf }
0x1028   :  { %v1910_v15 = vpop.f32.mrb[39].mxu1  ;;  %v1926_v16 = vsel %vm663_vm13, %v1922_v13, -inf  ;;  %v1925_v18 = vsel %vm59_vm12, %v3147_v14, -1e+30  ;;  %v3357_v14 = vld [vmem:[%s4387_s5 + $0x68] sm:$0xff]  }
0x1029   :  { %v1923_v22 = vsel %vm59_vm12, %v1910_v15, -1e+30  ;;  %1927 = vmax.xlane.f32.xlu0 %v1926_v16  ;;  %v1935_v27 = vsel %vm663_vm13, %v1925_v18, -inf  ;;  %3165 = vmatpush3.bf16.msra.mxu0 %v3357_v14  ;;  %v3358_v15 = vld [vmem:[%s4387_s5 + $0x70] sm:$0xff]   ;;  %v3359_v16 = vld [vmem:[%s4387_s5 + $0x78] sm:$0xff]   ;;  %v2189_v14 = vrot.slane %v4101_v50, %v3960_v2 }
0x102a   :  { %v1929_v25 = vsel %vm663_vm13, %v1923_v22, -inf  ;;  %3166 = vmatprep.subr.bf16.mxu0 %v3511_v1 }
0x102b   :  { %1930 = vmax.xlane.f32.xlu1 %v1929_v25 }
0x102d   :  { %1933 = vmax.xlane.f32.xlu0 %v1932_v26  ;;  %3167 = vmatpush3.bf16.msra.mxu0 %v3358_v15 }
0x102e   :  { %3168 = vmatprep.subr.bf16.mxu0 %v3511_v1 }
0x102f   :  { %1936 = vmax.xlane.f32.xlu1 %v1935_v27 }
0x1031   :  { %3169 = vmatpush3.bf16.msra.mxu0 %v3359_v16 }
0x1032   :  { %3194 = vmatprep.subr.bf16.mxu0 %v3511_v1 }
0x10b6   :  { %v1928_v28 = vpop.xlane.xlu0 %1927 }
0x10b7   :  { %v1938_v31 = vsub.f32 %v1922_v13, %v1928_v28 }
0x10b8   :  { %v1931_v33 = vpop.xlane.xlu1 %1930 }
0x10b9   :  { %v1942_v58 = vmul.f32 1.442695, %v1938_v31  ;;  %v1939_v56 = vsub.f32 %v1923_v22, %v1931_v33 }
0x10ba   :  { %v1934_v34 = vpop.xlane.xlu0 %1933 }
0x10bb   :  { %3456 = vpow2.f32 %v1942_v58  ;;  %v1944_v45 = vmul.f32 1.442695, %v1939_v56  ;;  %v1940_v61 = vsub.f32 %v1924_v17, %v1934_v34 }
0x10bc   :  { %v1937_v36 = vpop.xlane.xlu1 %1936 }
0x10bd   :  { %3458 = vpow2.f32 %v1944_v45  ;;  %v1946_v57 = vmul.f32 1.442695, %v1940_v61  ;;  %v1941_v37 = vsub.f32 %v1925_v18, %v1937_v36  ;;  %v2151_v45 = vrot.slane %v4101_v50, %v1075_v21 }
0x10bf   :  { %3460 = vpow2.f32 %v1946_v57  ;;  %v1948_v12 = vmul.f32 1.442695, %v1941_v37 }
0x10c1   :  { %3462 = vpow2.f32 %v1948_v12  ;;  %v3362_v12 = vld [vmem:[%s4388_s6 + $0x50] sm:$0xff]  }
0x10c5   :  { %v3457_v40 = vpop.eup %3456 }
0x10c6   :  { %v1950_v41 = vsel %vm663_vm13, %v3457_v40, 0.0 }
0x10c7   :  { %v3459_v42 = vpop.eup %3458  ;;  %1951 = vadd.xlane.f32.xlu0 %v1950_v41  ;;  %v3364_v41 = vld [vmem:[%s4388_s6 + $0x60] sm:$0xff]  }
0x10c8   :  { %v1953_v44 = vsel %vm663_vm13, %v3459_v42, 0.0 }
0x10c9   :  { %v3461_v46 = vpop.eup %3460  ;;  %1954 = vadd.xlane.f32.xlu1 %v1953_v44  ;;  %v3366_v44 = vld [vmem:[%s4388_s6 + $0x70] sm:$0xff]  }
0x10ca   :  { %v1956_v48 = vsel %vm663_vm13, %v3461_v46, 0.0 }
0x10cb   :  { %v3463_v60 = vpop.eup %3462  ;;  %1957 = vadd.xlane.f32.xlu0 %v1956_v48 }
0x10cc   :  { %v1959_v20 = vsel %vm663_vm13, %v3463_v60, 0.0 }
0x10cd   :  { %1960 = vadd.xlane.f32.xlu1 %v1959_v20 }
0x1154   :  { %v1952_v54 = vpop.xlane.xlu0 %1951 }
0x1155   :  { %3464 = vrcp.f32 %v1952_v54 }
0x1156   :  { %v1955_v59 = vpop.xlane.xlu1 %1954 }
0x1157   :  { %3466 = vrcp.f32 %v1955_v59 }
0x1158   :  { %v1958_v62 = vpop.xlane.xlu0 %1957 }
0x1159   :  { %3468 = vrcp.f32 %v1958_v62 }
0x115a   :  { %v1961_v63 = vpop.xlane.xlu1 %1960 }
0x115b   :  { %3470 = vrcp.f32 %v1961_v63 }
0x115f   :  { %v3465_v0 = vpop.eup %3464 }
0x1160   :  { %v1966_v19 = vmul.f32 %v3465_v0, %v3457_v40  ;;  %v3363_v40 = vld [vmem:[%s4388_s6 + $0x58] sm:$0xff]  }
0x1161   :  { %v3467_v35 = vpop.eup %3466 }
0x1162   :  { %v1967_v4 = vmul.f32 %v3467_v35, %v3459_v42  ;;  %v3365_v42 = vld [vmem:[%s4388_s6 + $0x68] sm:$0xff]  }
0x1163   :  { %v3469_v5 = vpop.eup %3468 }
0x1164   :  { %v1970_v7 = vpack.c.bf16 %v1967_v4, %v1966_v19  ;;  %v1968_v29 = vmul.f32 %v3469_v5, %v3461_v46  ;;  %v3367_v46 = vld [vmem:[%s4388_s6 + $0x78] sm:$0xff]   ;;  %v2183_v4 = vrot.slane %v4101_v50, %v3954_v38 }
0x1165   :  { %v3471_v39 = vpop.eup %3470 }
0x1166   :  { %v1969_v32 = vmul.f32 %v3471_v39, %v3463_v60  ;;  %3150 = vmatprep.mubr.msk.bf16.mxu1 %vm663_vm13, %v1970_v7 }
0x1168   :  { %v1971_v13 = vpack.c.bf16 %v1969_v32, %v1968_v29 }
0x116a   :  { %3151 = vmatmul.mubr.msk.bf16.vlgmr.msra.gmra.mrb[40].mxu1 %vm663_vm13, %v1971_v13 }
0x116b   :  { %3190 = vmatprep.mubr.msk.bf16.mxu1 %vm3513_vm0, %v3511_v1 }
0x123d   :  { %v3152_v17 = vpop.f32.mrb[40].mxu1 }
0x123e   :  { %v2017_v22 = vpop.f32.mrb[41].mxu1  ;;  %v2034_v28 = vmul.f32 %v3152_v17, %v3795_v23 }
0x123f   :  { %v3153_v25 = vpop.f32.mrb[42].mxu1  ;;  %v2032_v26 = vmul.f32 %v3777_v8, %v2017_v22 }
0x1240   :  { %v2020_v18 = vpop.f32.mrb[43].mxu1  ;;  %v2035_v33 = vmul.f32 %v3153_v25, %v3798_v24  ;;  %v3368_v25 = vld [vmem:[%s4389_s7 + $0x40] sm:$0xff]  }
0x1241   :  { %v2033_v27 = vmul.f32 %v3780_v9, %v2020_v18  ;;  %v3369_v18 = vld [vmem:[%s4389_s7 + $0x48] sm:$0xff]  }
0x1243   :  { %v2036_v31 = vadd.f32 %v2033_v27, %v2032_v26  ;;  %v3370_v26 = vld [vmem:[%s4389_s7 + $0x50] sm:$0xff]   ;;  %v3371_v27 = vld [vmem:[%s4389_s7 + $0x58] sm:$0xff]  }
0x1245   :  { %v2037_v58 = vadd.f32 %v2036_v31, %v2034_v28  ;;  %v3372_v28 = vld [vmem:[%s4389_s7 + $0x60] sm:$0xff]   ;;  %v3373_v31 = vld [vmem:[%s4389_s7 + $0x68] sm:$0xff]  }
0x1247   :  { %v2038_v56 = vadd.f32 %v2037_v58, %v2035_v33  ;;  %v3374_v33 = vld [vmem:[%s4389_s7 + $0x70] sm:$0xff]   ;;  %v3375_v58 = vld [vmem:[%s4389_s7 + $0x78] sm:$0xff]  }
0x1249   :  { %v2039_v34 = vpack.c.bf16 %v2038_v56, %v4176_v10  ;;  %v2213_v56 = vrot.slane %v4114_v11, %v3640_v47 }
0x124b   :  { %3171 = vmatmul.mubr.bf16.vlgmr.msra.gmra.mrb[20].mxu0 %v2039_v34 }
0x124c   :  { %3210 = vmatprep.mubr.msk.bf16.mxu0 %vm3513_vm0, %v3511_v1  ;;  %3195 = vmatpush3.bf16.msra.mxu0 %v3368_v25 }
0x124d   :  { %3196 = vmatprep.subr.bf16.mxu0 %v3511_v1 }
0x1250   :  { %3197 = vmatpush3.bf16.msra.mxu0 %v3369_v18 }
0x1251   :  { %3198 = vmatprep.subr.bf16.mxu0 %v3511_v1 }
0x1254   :  { %3199 = vmatpush3.bf16.msra.mxu0 %v3370_v26  ;;  %v3486_v26 = vld [vmem:[%s4385_s3] sm:$0xf]  ;;  %s3515_s3 = smov [#allocation2]  }
0x1255   :  { %3200 = vmatprep.subr.bf16.mxu0 %v3511_v1 }
0x1258   :  { %3201 = vmatpush3.bf16.msra.mxu0 %v3371_v27  ;;  %v2475_v27 = vrot.slane %v3486_v26, %v3954_v38  ;;  %v3514_v38 = vmov 1966171168  }
0x1259   :  { %3202 = vmatprep.subr.bf16.mxu0 %v3511_v1 }
0x125c   :  { %3203 = vmatpush3.bf16.msra.mxu0 %v3372_v28 }
0x125d   :  { %3204 = vmatprep.subr.bf16.mxu0 %v3511_v1 }
0x1260   :  { %3205 = vmatpush3.bf16.msra.mxu0 %v3373_v31 }
0x1261   :  { %3206 = vmatprep.subr.bf16.mxu0 %v3511_v1 }
0x1264   :  { %3207 = vmatpush3.bf16.msra.mxu0 %v3374_v33 }
0x1265   :  { %3208 = vmatprep.subr.bf16.mxu0 %v3511_v1 }
0x1268   :  { %3209 = vmatpush3.bf16.msra.mxu0 %v3375_v58  ;;  %v2481_v58 = vrot.slane %v3486_v26, %v3960_v2 }
0x131e   :  { %v2139_v8 = vpop.f32.mrb[20].mxu0 }
0x131f   :  { %v2146_v9 = vadd.f32 %v2139_v8, %v4013_v3  ;;  %v3172_v61 = vpop.f32.mrb[21].mxu0  ;;  %v3360_v3 = vld [vmem:[%s4388_s6 + $0x40] sm:$0xff]  }
0x1320   :  { %v2142_v23 = vpop.f32.mrb[22].mxu0  ;;  %3175 = vmatpush3.bf16.msra.mxu1 %v3360_v3 }
0x1321   :  { %v4241_v36 = vadd.f32 %v2151_v45, %v2146_v9  ;;  %v2147_v24 = vadd.f32 %v2142_v23, %v4016_v6  ;;  %v3173_v57 = vpop.f32.mrb[23].mxu0  ;;  %3176 = vmatprep.subr.bf16.mxu1 %v3511_v1  ;;  %v3361_v6 = vld [vmem:[%s4388_s6 + $0x48] sm:$0xff]  }
0x1323   :  { %v4244_v37 = vadd.f32 %v2151_v45, %v2147_v24  ;;  %2154 = vadd.xlane.f32.xlu0 %v4241_v36  ;;  %v2160_v10 = vmul.f32 %v4241_v36, %v4241_v36 }
0x1324   :  { %3177 = vmatpush3.bf16.msra.mxu1 %v3361_v6 }
0x1325   :  { %2156 = vadd.xlane.f32.xlu1 %v4244_v37  ;;  %v2161_v21 = vmul.f32 %v4244_v37, %v4244_v37  ;;  %3178 = vmatprep.subr.bf16.mxu1 %v3511_v1 }
0x1327   :  { %2162 = vadd.xlane.f32.xlu0 %v2160_v10 }
0x1328   :  { %3179 = vmatpush3.bf16.msra.mxu1 %v3362_v12 }
0x1329   :  { %2164 = vadd.xlane.f32.xlu1 %v2161_v21  ;;  %3180 = vmatprep.subr.bf16.mxu1 %v3511_v1 }
0x132c   :  { %3181 = vmatpush3.bf16.msra.mxu1 %v3363_v40 }
0x132d   :  { %3182 = vmatprep.subr.bf16.mxu1 %v3511_v1 }
0x1330   :  { %3183 = vmatpush3.bf16.msra.mxu1 %v3364_v41 }
0x1331   :  { %3184 = vmatprep.subr.bf16.mxu1 %v3511_v1 }
0x1334   :  { %3185 = vmatpush3.bf16.msra.mxu1 %v3365_v42 }
0x1335   :  { %3186 = vmatprep.subr.bf16.mxu1 %v3511_v1 }
0x1338   :  { %3187 = vmatpush3.bf16.msra.mxu1 %v3366_v44 }
0x1339   :  { %3188 = vmatprep.subr.bf16.mxu1 %v3511_v1 }
0x133c   :  { %3189 = vmatpush3.bf16.msra.mxu1 %v3367_v46 }
0x133d   :  { %3214 = vmatprep.subr.bf16.mxu1 %v3511_v1 }
0x13b0   :  { %v2155_v48 = vpop.xlane.xlu0 %2154 }
0x13b1   :  { %v2158_v60 = vmul.f32 0.03125, %v2155_v48 }
0x13b2   :  { %v2157_v20 = vpop.xlane.xlu1 %2156 }
0x13b3   :  { %v2159_v30 = vmul.f32 0.03125, %v2157_v20  ;;  %v2168_v55 = vmul.f32 %v2158_v60, %v2158_v60  ;;  %v2172_v19 = vsub.f32 %v4241_v36, %v2158_v60  ;;  %v2431_v60 = vrot.slane %v4101_v50, %v1353_v52  ;;  %v3376_v50 = vld [vmem:[%s4391_s9] sm:$0xff]  }
0x13b4   :  { %v2163_v49 = vpop.xlane.xlu0 %2162 }
0x13b5   :  { %v2166_v51 = vmul.f32 0.03125, %v2163_v49  ;;  %v2169_v54 = vmul.f32 %v2159_v30, %v2159_v30  ;;  %v2173_v7 = vsub.f32 %v4244_v37, %v2159_v30 }
0x13b6   :  { %v2165_v53 = vpop.xlane.xlu1 %2164 }
0x13b7   :  { %v2170_v59 = vsub.f32 %v2166_v51, %v2168_v55  ;;  %v2167_v62 = vmul.f32 0.03125, %v2165_v53 }
0x13b9   :  { %v2174_v63 = vadd.f32 1e-05, %v2170_v59  ;;  %v2171_v0 = vsub.f32 %v2167_v62, %v2169_v54 }
0x13bb   :  { %3472 = vrsqrt.f32 %v2174_v63  ;;  %v2175_v35 = vadd.f32 1e-05, %v2171_v0 }
0x13bd   :  { %3474 = vrsqrt.f32 %v2175_v35 }
0x13c5   :  { %v3473_v5 = vpop.eup %3472 }
0x13c6   :  { %v2178_v39 = vmul.f32 %v3473_v5, %v2172_v19  ;;  %v3378_v19 = vld [vmem:[%s4391_s9 + $0x10] sm:$0xff]   ;;  %v3380_v5 = vld [vmem:[%s4391_s9 + $0x20] sm:$0xff]  }
0x13c7   :  { %v3475_v29 = vpop.eup %3474 }
0x13c8   :  { %v2179_v32 = vmul.f32 %v3475_v29, %v2173_v7  ;;  %v2184_v13 = vmul.f32 %v2183_v4, %v2178_v39  ;;  %v3381_v7 = vld [vmem:[%s4391_s9 + $0x28] sm:$0xff]   ;;  %v3382_v39 = vld [vmem:[%s4391_s9 + $0x30] sm:$0xff]   ;;  %v3383_v29 = vld [vmem:[%s4391_s9 + $0x38] sm:$0xff]  }
0x13ca   :  { %v2185_v15 = vmul.f32 %v2183_v4, %v2179_v32  ;;  %v2190_v16 = vadd.f32 %v2189_v14, %v2184_v13  ;;  %v3379_v4 = vld [vmem:[%s4391_s9 + $0x18] sm:$0xff]  }
0x13cc   :  { %v2191_v17 = vadd.f32 %v2189_v14, %v2185_v15 }
0x13ce   :  { %v2192_v22 = vpack.c.bf16 %v2191_v17, %v2190_v16 }
0x13d0   :  { %3191 = vmatmul.mubr.bf16.vlgmr.msra.gmra.mrb[44].mxu1 %v2192_v22 }
0x13d1   :  { %3230 = vmatprep.mubr.msk.bf16.mxu1 %vm3513_vm0, %v3511_v1  ;;  %3215 = vmatpush3.bf16.msra.mxu1 %v3376_v50 }
0x13d2   :  { %3216 = vmatprep.subr.bf16.mxu1 %v3511_v1 }
0x14a3   :  { %v2296_v34 = vpop.f32.mrb[44].mxu1 }
0x14a4   :  { %v2297_v45 = vadd.f32 %v2296_v34, %v2213_v56  ;;  %v3192_v8 = vpop.f32.mrb[45].mxu1 }
0x14a5   :  { %v2299_v9 = vpop.f32.mrb[46].mxu1 }
0x14a6   :  { %v2835_v61 = vmul.f32 -1.702, %v2297_v45  ;;  %v2300_v23 = vadd.f32 %v2299_v9, %v2213_v56  ;;  %v3193_v24 = vpop.f32.mrb[47].mxu1 }
0x14a8   :  { %v2307_v57 = vmul.f32 1.442695, %v2835_v61  ;;  %v2836_v10 = vmul.f32 -1.702, %v2300_v23 }
0x14aa   :  { %3476 = vpow2.f32 %v2307_v57  ;;  %v2309_v21 = vmul.f32 1.442695, %v2836_v10 }
0x14ac   :  { %3478 = vpow2.f32 %v2309_v21 }
0x14b4   :  { %v3477_v3 = vpop.eup %3476 }
0x14b5   :  { %v2311_v6 = vadd.f32 1.0, %v3477_v3 }
0x14b6   :  { %v3479_v12 = vpop.eup %3478 }
0x14b7   :  { %3480 = vrcp.f32 %v2311_v6  ;;  %v2312_v40 = vadd.f32 1.0, %v3479_v12  ;;  %v2600_v6 = vunpack.c.l.s4 %v3514_v38 }
0x14b9   :  { %3482 = vrcp.f32 %v2312_v40  ;;  %v2601_v12 = vunpack.c.0.s8 %v2600_v6 }
0x14bb   :  { %v2604_v40 = vsub.s32 %v2601_v12, %v3631_v43 }
0x14c1   :  { %v3481_v41 = vpop.eup %3480 }
0x14c2   :  { %v2317_v11 = vmul.f32 %v3481_v41, %v2297_v45 }
0x14c3   :  { %v3483_v47 = vpop.eup %3482 }
0x14c4   :  { %v2318_v42 = vmul.f32 %v3483_v47, %v2300_v23 }
0x14c6   :  { %v2319_v44 = vpack.c.bf16 %v2318_v42, %v2317_v11 }
0x14c8   :  { %3211 = vmatmul.mubr.bf16.vlgmr.msra.gmra.mrb[24].mxu0 %v2319_v44 }
0x159b   :  { %v2419_v46 = vpop.f32.mrb[24].mxu0 }
0x159c   :  { %v2426_v48 = vadd.f32 %v2419_v46, %v4241_v36  ;;  %v3212_v20 = vpop.f32.mrb[25].mxu0 }
0x159d   :  { %v2422_v30 = vpop.f32.mrb[26].mxu0 }
0x159e   :  { %v2427_v49 = vadd.f32 %v2422_v30, %v4244_v37  ;;  %v3213_v55 = vpop.f32.mrb[27].mxu0  ;;  %v2432_v51 = vadd.f32 %v2431_v60, %v2426_v48  ;;  %v3377_v37 = vld [vmem:[%s4391_s9 + $0x8] sm:$0xff]   ;;  %s2630_s9 = sshll.u32 %s3515_s3, 4  ;;  %s2631_s9 = int_to_ptr.vmem [resolvable:$true] %s2630_s9 }
0x159f   :  { %3217 = vmatpush3.bf16.msra.mxu1 %v3377_v37  ;;  %s3487_s2 = scalar_lea.vmem %s2631_s9, 32  ;;  %p3492_p1 = scmp.lt.s32.totalorder %s2631_s9, %s2631_s9 }
0x15a0   :  { %v2433_v53 = vadd.f32 %v2431_v60, %v2427_v49  ;;  %v2445_v63 = vmul.f32 %v2432_v51, %v2432_v51  ;;  %3218 = vmatprep.subr.bf16.mxu1 %v3511_v1  ;;  %p3488_p0 = scmp.ne.s32.totalorder %s2631_s9, %s3487_s2  ;;  %p3493_p2 = scmp.lt.s32.totalorder %s3487_s2, %s3487_s2 }
0x15a2   :  { %v2436_v54 = vrot.slane %v2433_v53, 7  ;;  %v2446_v59 = vmul.f32 %v2433_v53, %v2433_v53  ;;  %p3494_p3 = por %p3493_p2, %p3492_p1 }
0x15a3   :  { %3219 = vmatpush3.bf16.msra.mxu1 %v3378_v19 }
0x15a4   :  { %v2438_v62 = vsel %vm2437_vm14, %v2436_v54, %v2432_v51  ;;  %v2449_v0 = vrot.slane %v2446_v59, 7  ;;  %3220 = vmatprep.subr.bf16.mxu1 %v3511_v1  ;;  %p3495_p4 = pnand %p3494_p3, %p3488_p0 }
0x15a5   :  { %v2441_v36 = vsel %vm2440_vm15, %v2438_v62, 0.0 }
0x15a6   :  { %2442 = vadd.xlane.f32.xlu0 %v2441_v36  ;;  %v2450_v35 = vsel %vm2437_vm14, %v2449_v0, %v2445_v63 }
0x15a7   :  { %v2452_v52 = vsel %vm2440_vm15, %v2450_v35, 0.0  ;;  %3221 = vmatpush3.bf16.msra.mxu1 %v3379_v4 }
0x15a8   :  { %2453 = vadd.xlane.f32.xlu1 %v2452_v52  ;;  %3222 = vmatprep.subr.bf16.mxu1 %v3511_v1 }
0x15ab   :  { %3223 = vmatpush3.bf16.msra.mxu1 %v3380_v5 }
0x15ac   :  { %3224 = vmatprep.subr.bf16.mxu1 %v3511_v1 }
0x15af   :  { %3225 = vmatpush3.bf16.msra.mxu1 %v3381_v7 }
0x15b0   :  { %3226 = vmatprep.subr.bf16.mxu1 %v3511_v1 }
0x15b3   :  { %3227 = vmatpush3.bf16.msra.mxu1 %v3382_v39 }
0x15b4   :  { %3228 = vmatprep.subr.bf16.mxu1 %v3511_v1 }
0x15b7   :  { %3229 = vmatpush3.bf16.msra.mxu1 %v3383_v29 }
0x1633   :  { %v2443_v32 = vpop.xlane.xlu0 %2442 }
0x1634   :  { %v2444_v13 = vmul.f32 0.03125, %v2443_v32 }
0x1635   :  { %v2454_v14 = vpop.xlane.xlu1 %2453 }
0x1636   :  { %v2455_v15 = vmul.f32 0.03125, %v2454_v14  ;;  %v2456_v16 = vmul.f32 %v2444_v13, %v2444_v13  ;;  %v2459_v25 = vrot.slane %v2444_v13, 1  ;;  %v2462_v18 = vsub.f32 %v2432_v51, %v2444_v13 }
0x1638   :  { %v2457_v17 = vsub.f32 %v2455_v15, %v2456_v16  ;;  %v2463_v31 = vsub.f32 %v2433_v53, %v2459_v25 }
0x163a   :  { %v2464_v22 = vadd.f32 1e-05, %v2457_v17 }
0x163c   :  { %3484 = vrsqrt.f32 %v2464_v22 }
0x1646   :  { %v3485_v28 = vpop.eup %3484 }
0x1647   :  { %v2467_v1 = vrot.slane %v3485_v28, 1  ;;  %v2470_v33 = vmul.f32 %v3485_v28, %v2462_v18 }
0x1649   :  { %v2471_v56 = vmul.f32 %v2467_v1, %v2463_v31  ;;  %v2476_v34 = vmul.f32 %v2475_v27, %v2470_v33 }
0x164b   :  { %v2477_v45 = vmul.f32 %v2475_v27, %v2471_v56  ;;  %v2482_v8 = vadd.f32 %v2481_v58, %v2476_v34 }
0x164d   :  { %v2483_v9 = vadd.f32 %v2481_v58, %v2477_v45  ;;  %v2484_v61 = vpack.c.bf16 %v2482_v8, %v2482_v8 }
0x164f   :  { %v2485_v23 = vpack.c.bf16 %v2483_v9, %v2483_v9  ;;  %v2504_v57 = vunpack.c.l.b16 %v2484_v61 }
0x1651   :  { %v2505_v24 = vunpack.c.l.b16 %v2485_v23 }
0x1653   :  { %v2506_v10 = vrot.slane %v2505_v24, 7 }
0x1655   :  { %v2507_v21 = vsel %vm2437_vm14, %v2506_v10, %v2504_v57 }
0x1656   :  { %v2508_v3 = vpack.c.b16 %v2507_v21, %v2507_v21 }
0x1658   :  { %3231 = vmatmul.mubr.bf16.vlgmr.msra.gmra.mrb[48].mxu1 %v2508_v3 }
0x172b   :  { %v2592_v2 = vpop.f32.mrb[48].mxu1 }
0x172c   :  { %v2605_v41 = vrot.slane %v2592_v2, %v2604_v40  ;;  %v3232_v47 = vpop.f32.mrb[49].mxu1 }
0x172d   :  { %v2595_v11 = vpop.f32.mrb[50].mxu1 }
0x172e   :  { %v2606_v42 = vcombine.high %v2605_v41, %v2605_v41  ;;  %2869 = vst.sshfl [vmem:[#allocation2] sm:$0x1 pattern:$0x73625140] %v2605_v41  ;;  %v3233_v44 = vpop.f32.mrb[51].mxu1 }
0x1730   :  { %2870 = vst.sshfl [vmem:[#allocation2 + $0x1] sm:$0x1 pattern:$0x73625140] %v2606_v42 }
0x1731   :  { %3498 = shalt.err (!%p3495_p4)
}
0x1732   :  { %s3499_s13 = scalar_lea.hbm %s4392_s10, 32 }
0x1733   :  { %p3500_p5 = scmp.ne.s32.totalorder %s4392_s10, %s3499_s13  ;;  %p3503_p6 = scmp.lt.u32.totalorder %s3499_s13, %s4392_s10 }
0x1735   :  { %p3505_p7 = pnand %p3503_p6, %p3500_p5 }
0x1737   :  { %3508 = shalt.err (!%p3505_p7)
}
0x1738   :  { %s3516_s17 = smov 16   ;;  %s3517_s18 = smov 1  }
0x1739   :  { %2636 = dma.vmem_to_hbm [thread:$0]  %s2631_s9, 32, %s4392_s10, [#allocation3], %s3516_s17, %s3516_s17, %s3517_s18  }
0x173a   :  { %3509 = dma.done.wait [#allocation3], 32  }
0x173b   :  { %3510 = vsyncadd [#allocation3], 4294967264 }
0x173c   :  { %2640 = vsyncpa [#allocation3], 1 }

</bundles_post_ra>
